<compile_context>
chip_gen: v6e
topology: v6e:2x2x1
jax: 0.10.0
libtpu: 0.0.40
codegen_flags: <defaults>
</compile_context>

<pallas_src>
import functools

import jax
import jax.numpy as jnp
from jax.experimental import pallas as pl
from jax.experimental.pallas import tpu as pltpu

EPS = 1e-5
LANE = 128
MAX_TM = 2048                        # upper bound on the M tile (multiple of 8)
VMEM_LIMIT = 32 * 1024 * 1024        # scoped-VMEM budget, safe on v5e/v6e/v7x
FUSED_VMEM_BUDGET = 16 * 1024 * 1024  # per-image footprint ceiling for fused conv2


# ---------------------------------------------------------------------------
# Pallas kernels
# ---------------------------------------------------------------------------
def _matmul_stats_kernel(p_ref, w_ref, y_ref, stats_ref):
    # (TM, Kp) @ (Kp, Cp) on the MXU: bf16 inputs, f32 accumulation.
    y = jnp.dot(p_ref[...], w_ref[...], preferred_element_type=jnp.float32)
    # Per-tile partial BatchNorm statistics (row 0: sum, row 1: sum of squares),
    # reduced in f32 before the bf16 cast.  Rows 2-7 are never read downstream.
    stats_ref[0:1, :] = jnp.sum(y, axis=0, keepdims=True)
    stats_ref[1:2, :] = jnp.sum(y * y, axis=0, keepdims=True)
    y_ref[...] = y.astype(y_ref.dtype)                      # bf16 writeback


def _bn_silu_kernel(y_ref, scale_ref, shift_ref, o_ref):
    # Fused affine normalize + SiLU (single multiply-add, no (y-mean) temporaries).
    z = y_ref[...].astype(jnp.float32) * scale_ref[...] + shift_ref[...]
    o_ref[...] = (z * jax.nn.sigmoid(z)).astype(o_ref.dtype)


def _conv3x3_fused_kernel(yp_ref, w_ref, mask_ref, y2_ref, stats_ref, acc_ref,
                          *, WP, S):
    # One zero-padded image (flattened to (S, Cp) with row pitch WP) resident in
    # VMEM.  3x3 / pad-1 / stride-1 conv == 9 shifted full-image matmuls:
    #   acc[r] += (x @ W_t)[r + s_t],  s_t = (di-1)*WP + (dj-1)
    # Only interior rows of acc are exact; the pad ring holds partial sums and is
    # excluded from the BN statistics via the interior mask and cropped later.
    xf = yp_ref[0]                                           # (S, Cp) bf16
    acc_ref[...] = jnp.zeros_like(acc_ref)
    for t in range(9):
        di, dj = divmod(t, 3)
        s = (di - 1) * WP + (dj - 1)
        ti = jnp.dot(xf, w_ref[t], preferred_element_type=jnp.float32)  # (S, Cp)
        lo, hi = max(0, -s), S - max(0, s)                   # static bounds
        acc_ref[lo:hi, :] += ti[lo + s:hi + s, :]
    a = acc_ref[...]
    m = mask_ref[...]                                        # (1, S) interior mask
    # Masked per-channel sums as tiny MXU matmuls: (1,S)@(S,Cp).
    stats_ref[0:1, :] = jnp.dot(m, a, preferred_element_type=jnp.float32)
    stats_ref[1:2, :] = jnp.dot(m, a * a, preferred_element_type=jnp.float32)
    y2_ref[0] = a.astype(y2_ref.dtype)                       # bf16 pre-BN output


# ---------------------------------------------------------------------------
# pallas_call wrappers
# ---------------------------------------------------------------------------
def _conv_matmul_stats(patches, w_mat, tm):
    Mp, Kp = patches.shape
    Cp = w_mat.shape[1]
    nt = Mp // tm
    return pl.pallas_call(
        _matmul_stats_kernel,
        out_shape=(jax.ShapeDtypeStruct((Mp, Cp), jnp.bfloat16),
                   jax.ShapeDtypeStruct((nt * 8, Cp), jnp.float32)),
        grid=(nt,),
        in_specs=[pl.BlockSpec((tm, Kp), lambda i: (i, 0)),
                  pl.BlockSpec((Kp, Cp), lambda i: (0, 0))],
        out_specs=(pl.BlockSpec((tm, Cp), lambda i: (i, 0)),
                   pl.BlockSpec((8, Cp), lambda i: (i, 0))),
        compiler_params=pltpu.CompilerParams(
            dimension_semantics=("parallel",),
            vmem_limit_bytes=VMEM_LIMIT),
    )(patches, w_mat)


def _bn_silu_rows(y, scale, shift, tm, out_dtype):
    Mp, Cp = y.shape
    return pl.pallas_call(
        _bn_silu_kernel,
        out_shape=jax.ShapeDtypeStruct((Mp, Cp), out_dtype),
        grid=(Mp // tm,),
        in_specs=[pl.BlockSpec((tm, Cp), lambda i: (i, 0)),
                  pl.BlockSpec((1, Cp), lambda i: (0, 0)),
                  pl.BlockSpec((1, Cp), lambda i: (0, 0))],
        out_specs=pl.BlockSpec((tm, Cp), lambda i: (i, 0)),
        compiler_params=pltpu.CompilerParams(
            dimension_semantics=("parallel",),
            vmem_limit_bytes=VMEM_LIMIT),
    )(y, scale.reshape(1, Cp), shift.reshape(1, Cp))


def _bn_silu_images(y, scale, shift, out_dtype):
    N, S, Cp = y.shape
    return pl.pallas_call(
        _bn_silu_kernel,
        out_shape=jax.ShapeDtypeStruct((N, S, Cp), out_dtype),
        grid=(N,),
        in_specs=[pl.BlockSpec((1, S, Cp), lambda n: (n, 0, 0)),
                  pl.BlockSpec((1, Cp), lambda n: (0, 0)),
                  pl.BlockSpec((1, Cp), lambda n: (0, 0))],
        out_specs=pl.BlockSpec((1, S, Cp), lambda n: (n, 0, 0)),
        compiler_params=pltpu.CompilerParams(
            dimension_semantics=("parallel",),
            vmem_limit_bytes=VMEM_LIMIT),
    )(y, scale.reshape(1, Cp), shift.reshape(1, Cp))


# ---------------------------------------------------------------------------
# Plain-JAX glue: im2col, weight reshaping, positional columns, BN finalize
# ---------------------------------------------------------------------------
def _round_up(x, m):
    return (x + m - 1) // m * m


def _pick_tiles(M, Kp, Cp, max_tm=MAX_TM):
    """Pick (tm, nt, Mp): M padded only to a multiple of 8, nt >= 2 when possible
    (v7x megacore), per-step double-buffered footprint kept well under VMEM."""
    M8 = _round_up(max(M, 8), 8)
    cap = max(512, (20 * 1024 * 1024) // (4 * (Kp + Cp)))    # bf16, double-buffered
    max_tm = max(8, min(max_tm, cap) // 8 * 8)
    nt = max(1, -(-M8 // max_tm))
    if nt == 1 and M8 >= 16:
        nt = 2                                               # keep both v7x TCs busy
    if M8 % (8 * nt) == 0:
        tm = M8 // nt                                        # exact, zero M padding
    else:
        tm = _round_up(-(-M8 // nt), 8)                      # overshoot < nt*8 rows
    return tm, nt, nt * tm


def _im2col(x_nhwc, stride):
    """(N, H, W, C) -> (N*Ho*Wo, 9*C) patches of a 3x3 / pad-1 conv (input dtype)."""
    N, H, W, C = x_nhwc.shape
    pad, k = 1, 3
    xp = jnp.pad(x_nhwc, ((0, 0), (pad, pad), (pad, pad), (0, 0)))
    Ho = (H + 2 * pad - k) // stride + 1
    Wo = (W + 2 * pad - k) // stride + 1
    cols = []
    for di in range(k):
        for dj in range(k):
            cols.append(xp[:, di:di + stride * Ho:stride, dj:dj + stride * Wo:stride, :])
    patches = jnp.stack(cols, axis=-2)                       # (N, Ho, Wo, 9, C)
    return patches.reshape(N * Ho * Wo, k * k * C), Ho, Wo


def _conv_weight_to_mat(w_oihw):
    """(Cout, Cin, 3, 3) -> (9*Cin, Cout), matching _im2col's (di, dj, cin) order."""
    cout = w_oihw.shape[0]
    return jnp.transpose(w_oihw, (2, 3, 1, 0)).reshape(-1, cout)


def _pos_columns(N, Ho, Wo):
    """Extra im2col columns [lin[i], lin[j], 1] replicating PositionalEncodingLayer's
    torch.meshgrid(indexing='ij') + permute broadcast quirk (requires h == w)."""
    assert Ho == Wo, "PositionalEncodingLayer only broadcasts correctly when h == w"
    lin = jnp.linspace(-1.0, 1.0, Ho, dtype=jnp.float32)
    ci = jnp.broadcast_to(lin[:, None], (Ho, Wo))            # lin[i]
    cj = jnp.broadcast_to(lin[None, :], (Ho, Wo))            # lin[j]
    ones = jnp.ones((Ho, Wo), jnp.float32)
    cols = jnp.stack([ci, cj, ones], axis=-1).reshape(Ho * Wo, 3)
    return jnp.tile(cols, (N, 1))                            # (N*Ho*Wo, 3)


def _finalize_bn(stats, count, gamma, beta, cout, Cp):
    """Per-tile (sum, sum_sq) -> folded per-channel scale/shift (f32).
    NOTE: single-pass E[x^2]-E[x]^2 in f32; fine for roughly zero-centered conv outs."""
    st = stats.reshape(-1, 8, stats.shape[-1])
    total = jnp.sum(st[:, 0, :], axis=0)
    total_sq = jnp.sum(st[:, 1, :], axis=0)
    mean = total / count
    var = jnp.maximum(total_sq / count - mean * mean, 0.0)
    inv = jax.lax.rsqrt(var + EPS)
    gamma_p = jnp.pad(gamma.astype(jnp.float32), (0, Cp - cout))
    beta_p = jnp.pad(beta.astype(jnp.float32), (0, Cp - cout))
    scale = gamma_p * inv
    shift = beta_p - mean * scale
    return scale, shift


# ---------------------------------------------------------------------------
# Conv(3x3) [+pos] + BatchNorm(train) + SiLU — im2col path (block 1 / fallback)
# ---------------------------------------------------------------------------
def _conv_block_im2col(x_nhwc, w_oihw, gamma, beta, stride, pos_wb, out_dtype):
    """Returns (act (Mp, Cp) out_dtype, M, Ho, Wo, Cp).  Channel-padded columns of
    `act` are exactly zero; rows >= M are garbage and must be cropped."""
    N = x_nhwc.shape[0]
    cout = w_oihw.shape[0]

    patches, Ho, Wo = _im2col(x_nhwc, stride)                # bf16 in -> bf16 out
    w_mat = _conv_weight_to_mat(w_oihw)
    if pos_wb is not None:
        # Fold the positional encoding into the matmul: 3 extra K columns/rows.
        w_enc, b_enc = pos_wb
        patches = jnp.concatenate(
            [patches, _pos_columns(N, Ho, Wo).astype(patches.dtype)], axis=1)
        w_mat = jnp.concatenate(
            [w_mat, jnp.stack([w_enc[:, 0], w_enc[:, 1], b_enc], axis=0)], axis=0)

    M, K = patches.shape
    Cp = _round_up(cout, LANE)
    Kp = _round_up(K, LANE)
    tm, _, Mp = _pick_tiles(M, Kp, Cp)

    patches_p = jnp.pad(patches, ((0, Mp - M), (0, Kp - K))).astype(jnp.bfloat16)
    w_p = jnp.pad(w_mat, ((0, Kp - K), (0, Cp - cout))).astype(jnp.bfloat16)

    # pass 1: conv-as-matmul + per-tile partial BN statistics (bf16 y writeback)
    y, stats = _conv_matmul_stats(patches_p, w_p, tm)
    # glue : finalize BN over the M *real* rows (zero-padded rows contribute 0)
    scale, shift = _finalize_bn(stats, M, gamma, beta, cout, Cp)
    # pass 2: normalize + SiLU (lane-dense tiled stores)
    act = _bn_silu_rows(y, scale, shift, tm, out_dtype)
    return act, M, Ho, Wo, Cp


# ---------------------------------------------------------------------------
# Conv(3x3, s1) + BatchNorm(train) + SiLU — fused per-image path (block 2)
# ---------------------------------------------------------------------------
def _conv_block_fused(a1_nhwc, w_oihw, gamma, beta, out_dtype):
    """a1_nhwc: (N, H, W, Cp) bf16, channel-padded (padded channels == 0).
    Returns (N, H, W, cout) out_dtype."""
    N, H, W, Cp = a1_nhwc.shape
    cout, cin = w_oihw.shape[0], w_oihw.shape[1]
    HP, WP = H + 2, W + 2
    S = HP * WP

    # One cheap bf16 pad/reshape instead of a 9x im2col expansion in HBM.
    yp = jnp.pad(a1_nhwc, ((0, 0), (1, 1), (1, 1), (0, 0))).reshape(N, S, Cp)
    wt = jnp.transpose(w_oihw, (2, 3, 1, 0)).reshape(9, cin, cout)
    wt = jnp.pad(wt, ((0, 0), (0, Cp - cin), (0, Cp - cout))).astype(jnp.bfloat16)
    rowm = (jnp.arange(HP) >= 1) & (jnp.arange(HP) <= H)
    colm = (jnp.arange(WP) >= 1) & (jnp.arange(WP) <= W)
    mask = (rowm[:, None] & colm[None, :]).astype(jnp.float32).reshape(1, S)

    kernel = functools.partial(_conv3x3_fused_kernel, WP=WP, S=S)
    y2, stats = pl.pallas_call(
        kernel,
        out_shape=(jax.ShapeDtypeStruct((N, S, Cp), jnp.bfloat16),
                   jax.ShapeDtypeStruct((N * 8, Cp), jnp.float32)),
        grid=(N,),
        in_specs=[pl.BlockSpec((1, S, Cp), lambda n: (n, 0, 0)),
                  pl.BlockSpec((9, Cp, Cp), lambda n: (0, 0, 0)),
                  pl.BlockSpec((1, S), lambda n: (0, 0))],
        out_specs=(pl.BlockSpec((1, S, Cp), lambda n: (n, 0, 0)),
                   pl.BlockSpec((8, Cp), lambda n: (n, 0))),
        scratch_shapes=[pltpu.VMEM((S, Cp), jnp.float32)],
        compiler_params=pltpu.CompilerParams(
            dimension_semantics=("parallel",),
            vmem_limit_bytes=VMEM_LIMIT),
    )(yp, wt, mask)

    scale, shift = _finalize_bn(stats, N * H * W, gamma, beta, cout, Cp)
    act = _bn_silu_images(y2, scale, shift, out_dtype)       # (N, S, Cp)
    # Crop the pad ring / padded channels (small, bf16/f32 copy in XLA).
    return act.reshape(N, HP, WP, Cp)[:, 1:H + 1, 1:W + 1, :cout]


# ---------------------------------------------------------------------------
# EncoderBock forward
# ---------------------------------------------------------------------------
def encoder_block_forward(x_nchw, params, use_positional_encoding):
    N = x_nchw.shape[0]
    cout = params["w1"].shape[0]
    x = jnp.transpose(x_nchw, (0, 2, 3, 1)).astype(jnp.bfloat16)     # NHWC, bf16
    pos_wb = (params["w_enc"], params["b_enc"]) if use_positional_encoding else None

    # block 1: Conv(3x3, s2, p1) [+ pos folded into the matmul] + BN + SiLU
    a1_flat, M1, H1, W1, Cp = _conv_block_im2col(
        x, params["w1"], params["gamma1"], params["beta1"],
        stride=2, pos_wb=pos_wb, out_dtype=jnp.bfloat16)
    a1 = a1_flat[:M1].reshape(N, H1, W1, Cp)   # keep channel padding (it is zero)

    # block 2: Conv(3x3, s1, p1) + BN + SiLU — fused per-image kernel (no im2col)
    S = (H1 + 2) * (W1 + 2)
    fused_bytes = 20 * S * Cp + 36 * Cp * Cp   # rough per-step VMEM footprint
    if fused_bytes <= FUSED_VMEM_BUDGET:
        y2 = _conv_block_fused(a1, params["w2"], params["gamma2"], params["beta2"],
                               out_dtype=jnp.float32)
    else:
        # Fallback for very large feature maps: im2col path.
        a2_flat, M2, _, _, _ = _conv_block_im2col(
            a1[..., :cout], params["w2"], params["gamma2"], params["beta2"],
            stride=1, pos_wb=None, out_dtype=jnp.float32)
        y2 = a2_flat[:M2, :cout].reshape(N, H1, W1, cout)

    return jnp.transpose(y2, (0, 3, 1, 2))                            # back to NCHW


# ---------------------------------------------------------------------------
# Pure-JAX f32 reference (for verification)
# ---------------------------------------------------------------------------
def reference_forward(x, params, use_positional_encoding):
    def conv(x, w, stride):
        return jax.lax.conv_general_dilated(
            x, w, (stride, stride), ((1, 1), (1, 1)),
            dimension_numbers=("NCHW", "OIHW", "NCHW"))

    def bn_silu(y, gamma, beta):
        mean = jnp.mean(y, axis=(0, 2, 3), keepdims=True)
        var = jnp.mean((y - mean) ** 2, axis=(0, 2, 3), keepdims=True)
        y = (y - mean) / jnp.sqrt(var + EPS)
        y = y * gamma.reshape(1, -1, 1, 1) + beta.reshape(1, -1, 1, 1)
        return y * jax.nn.sigmoid(y)

    y = conv(x, params["w1"], 2)
    if use_positional_encoding:
        _, _, Ho, Wo = y.shape
        assert Ho == Wo
        lin = jnp.linspace(-1.0, 1.0, Ho)
        # matches torch.meshgrid(indexing='ij') + permute broadcast quirk (h == w)
        emb = (lin[:, None, None] * params["w_enc"][:, 0]
               + lin[None, :, None] * params["w_enc"][:, 1]
               + params["b_enc"])                                     # (Ho, Wo, C)
        y = y + jnp.transpose(emb, (2, 0, 1))[None]
    y = bn_silu(y, params["gamma1"], params["beta1"])
    y = conv(y, params["w2"], 1)
    y = bn_silu(y, params["gamma2"], params["beta2"])
    return y


# ---------------------------------------------------------------------------
if __name__ == "__main__":
    key = jax.random.PRNGKey(0)
    ks = jax.random.split(key, 8)

    N, C_IN, C_OUT, H, W = 2, 4, 8, 16, 16
    use_pos = True

    params = {
        "w1": 0.1 * jax.random.normal(ks[0], (C_OUT, C_IN, 3, 3), jnp.float32),
        "w2": 0.1 * jax.random.normal(ks[1], (C_OUT, C_OUT, 3, 3), jnp.float32),
        "w_enc": 0.5 * jax.random.normal(ks[2], (C_OUT, 2), jnp.float32),
        "b_enc": 0.1 * jax.random.normal(ks[3], (C_OUT,), jnp.float32),
        "gamma1": 1.0 + 0.1 * jax.random.normal(ks[4], (C_OUT,), jnp.float32),
        "beta1": 0.1 * jax.random.normal(ks[5], (C_OUT,), jnp.float32),
        "gamma2": 1.0 + 0.1 * jax.random.normal(ks[6], (C_OUT,), jnp.float32),
        "beta2": 0.1 * jax.random.normal(ks[7], (C_OUT,), jnp.float32),
    }

    x = jax.random.normal(key, (N, C_IN, H, W), jnp.float32)

    fwd = jax.jit(functools.partial(encoder_block_forward,
                                    use_positional_encoding=use_pos))
    out = jax.block_until_ready(fwd(x, params))

    ref = jax.block_until_ready(reference_forward(x, params, use_pos))
    assert out.shape == (N, C_OUT, H // 2, W // 2), out.shape
    err = float(jnp.max(jnp.abs(out - ref)))
    # bf16 MXU inputs + bf16 pre-BN intermediates (f32 accumulation / f32 BN stats)
    # vs the pure-f32 reference: a few e-2 absolute difference on unit-variance
    # post-BN activations is expected.
    assert err < 1e-1, err

    print("KERNEL_OK")
</pallas_src>

<mosaic_0001>
module attributes {stable_mosaic.version = 11 : i64} {
  func.func @_matmul_stats_kernel(%arg0: i32, %arg1: memref<64x128xbf16, #tpu.memory_space<vmem>>, %arg2: memref<128x128xbf16, #tpu.memory_space<vmem>>, %arg3: memref<64x128xbf16, #tpu.memory_space<vmem>>, %arg4: memref<8x128xf32, #tpu.memory_space<vmem>>) attributes {dimension_semantics = [#tpu.dimension_semantics<parallel>], iteration_bounds = array<i64: 2>, scalar_prefetch = 0 : i64, scratch_operands = 0 : i64, tpu.core_type = #tpu.core_type<tc>, window_params = [{transform_indices = @transform_0, window_bounds = array<i64: 64, 128>}, {pipeline_mode = #tpu.pipeline_mode<synchronous>, transform_indices = @transform_1, window_bounds = array<i64: 128, 128>}, {transform_indices = @transform_2, window_bounds = array<i64: 64, 128>}, {transform_indices = @transform_3, window_bounds = array<i64: 8, 128>}]} {
    %c0 = arith.constant 0 : index
    %c0_0 = arith.constant 0 : index
    %0 = vector.load %arg1[%c0, %c0_0] : memref<64x128xbf16, #tpu.memory_space<vmem>>, vector<64x128xbf16>
    %c0_1 = arith.constant 0 : index
    %c0_2 = arith.constant 0 : index
    %1 = vector.load %arg2[%c0_1, %c0_2] : memref<128x128xbf16, #tpu.memory_space<vmem>>, vector<128x128xbf16>
    %cst = arith.constant dense<0.000000e+00> : vector<64x128xf32>
    %2 = tpu.matmul %0, %1, %cst {dimension_numbers = #tpu.dot_dimension_numbers<[1], [0], [0], [1], [0, 0, 1, 1], [], []>} : vector<64x128xbf16>, vector<128x128xbf16>, vector<64x128xf32> -> vector<64x128xf32>
    %cst_3 = arith.constant dense<0.000000e+00> : vector<128xf32>
    %3 = vector.multi_reduction <add>, %2, %cst_3 [0] : vector<64x128xf32> to vector<128xf32>
    %4 = vector.shape_cast %3 : vector<128xf32> to vector<1x128xf32>
    %c0_4 = arith.constant 0 : index
    %c0_5 = arith.constant 0 : index
    %5 = vector.load %arg4[%c0_4, %c0_5] : memref<8x128xf32, #tpu.memory_space<vmem>>, vector<1x128xf32>
    tpu.vector_store %arg4[%c0_4, %c0_5], %4 {strides = array<i32>} : memref<8x128xf32, #tpu.memory_space<vmem>>, vector<1x128xf32>,
    %6 = arith.mulf %2, %2 : vector<64x128xf32>
    %cst_6 = arith.constant dense<0.000000e+00> : vector<128xf32>
    %7 = vector.multi_reduction <add>, %6, %cst_6 [0] : vector<64x128xf32> to vector<128xf32>
    %8 = vector.shape_cast %7 : vector<128xf32> to vector<1x128xf32>
    %c1 = arith.constant 1 : index
    %c0_7 = arith.constant 0 : index
    %9 = vector.load %arg4[%c1, %c0_7] : memref<8x128xf32, #tpu.memory_space<vmem>>, vector<1x128xf32>
    tpu.vector_store %arg4[%c1, %c0_7], %8 {strides = array<i32>} : memref<8x128xf32, #tpu.memory_space<vmem>>, vector<1x128xf32>,
    %10 = arith.truncf %2 : vector<64x128xf32> to vector<64x128xbf16>
    %c0_8 = arith.constant 0 : index
    %c0_9 = arith.constant 0 : index
    %11 = vector.load %arg3[%c0_8, %c0_9] : memref<64x128xbf16, #tpu.memory_space<vmem>>, vector<64x128xbf16>
    tpu.vector_store %arg3[%c0_8, %c0_9], %10 {strides = array<i32>} : memref<64x128xbf16, #tpu.memory_space<vmem>>, vector<64x128xbf16>,
    return
  }
  func.func @transform_0(%arg0: i32) -> (i32, i32) {
    %c0_i32 = arith.constant 0 : i32
    %c0_i32_0 = arith.constant 0 : i32
    return %arg0, %c0_i32 : i32, i32
  }
  func.func @transform_1(%arg0: i32) -> (i32, i32) {
    %c0_i32 = arith.constant 0 : i32
    %c0_i32_0 = arith.constant 0 : i32
    %c0_i32_1 = arith.constant 0 : i32
    return %c0_i32, %c0_i32_0 : i32, i32
  }
  func.func @transform_2(%arg0: i32) -> (i32, i32) {
    %c0_i32 = arith.constant 0 : i32
    %c0_i32_0 = arith.constant 0 : i32
    return %arg0, %c0_i32 : i32, i32
  }
  func.func @transform_3(%arg0: i32) -> (i32, i32) {
    %c0_i32 = arith.constant 0 : i32
    %c0_i32_0 = arith.constant 0 : i32
    return %arg0, %c0_i32 : i32, i32
  }
}

module attributes {stable_mosaic.version = 11 : i64} {
  func.func @_bn_silu_kernel(%arg0: i32, %arg1: memref<64x128xbf16, #tpu.memory_space<vmem>>, %arg2: memref<1x128xf32, #tpu.memory_space<vmem>>, %arg3: memref<1x128xf32, #tpu.memory_space<vmem>>, %arg4: memref<64x128xbf16, #tpu.memory_space<vmem>>) attributes {dimension_semantics = [#tpu.dimension_semantics<parallel>], iteration_bounds = array<i64: 2>, scalar_prefetch = 0 : i64, scratch_operands = 0 : i64, tpu.core_type = #tpu.core_type<tc>, window_params = [{transform_indices = @transform_0, window_bounds = array<i64: 64, 128>}, {pipeline_mode = #tpu.pipeline_mode<synchronous>, transform_indices = @transform_1, window_bounds = array<i64: 1, 128>}, {pipeline_mode = #tpu.pipeline_mode<synchronous>, transform_indices = @transform_2, window_bounds = array<i64: 1, 128>}, {transform_indices = @transform_3, window_bounds = array<i64: 64, 128>}]} {
    %c0 = arith.constant 0 : index
    %c0_0 = arith.constant 0 : index
    %0 = vector.load %arg1[%c0, %c0_0] : memref<64x128xbf16, #tpu.memory_space<vmem>>, vector<64x128xbf16>
    %1 = arith.extf %0 : vector<64x128xbf16> to vector<64x128xf32>
    %c0_1 = arith.constant 0 : index
    %c0_2 = arith.constant 0 : index
    %2 = vector.load %arg2[%c0_1, %c0_2] : memref<1x128xf32, #tpu.memory_space<vmem>>, vector<1x128xf32>
    %3 = vector.broadcast %2 : vector<1x128xf32> to vector<64x128xf32>
    %4 = arith.mulf %1, %3 : vector<64x128xf32>
    %c0_3 = arith.constant 0 : index
    %c0_4 = arith.constant 0 : index
    %5 = vector.load %arg3[%c0_3, %c0_4] : memref<1x128xf32, #tpu.memory_space<vmem>>, vector<1x128xf32>
    %6 = vector.broadcast %5 : vector<1x128xf32> to vector<64x128xf32>
    %7 = arith.addf %4, %6 : vector<64x128xf32>
    %8 = arith.negf %7 : vector<64x128xf32>
    %9 = math.exp %8 : vector<64x128xf32>
    %cst = arith.constant 1.000000e+00 : f32
    %10 = vector.broadcast %cst : f32 to vector<64x128xf32>
    %11 = arith.addf %10, %9 : vector<64x128xf32>
    %12 = arith.divf %10, %11 : vector<64x128xf32>
    %13 = arith.mulf %7, %12 : vector<64x128xf32>
    %14 = arith.truncf %13 : vector<64x128xf32> to vector<64x128xbf16>
    %c0_5 = arith.constant 0 : index
    %c0_6 = arith.constant 0 : index
    %15 = vector.load %arg4[%c0_5, %c0_6] : memref<64x128xbf16, #tpu.memory_space<vmem>>, vector<64x128xbf16>
    tpu.vector_store %arg4[%c0_5, %c0_6], %14 {strides = array<i32>} : memref<64x128xbf16, #tpu.memory_space<vmem>>, vector<64x128xbf16>,
    return
  }
  func.func @transform_0(%arg0: i32) -> (i32, i32) {
    %c0_i32 = arith.constant 0 : i32
    %c0_i32_0 = arith.constant 0 : i32
    return %arg0, %c0_i32 : i32, i32
  }
  func.func @transform_1(%arg0: i32) -> (i32, i32) {
    %c0_i32 = arith.constant 0 : i32
    %c0_i32_0 = arith.constant 0 : i32
    %c0_i32_1 = arith.constant 0 : i32
    return %c0_i32, %c0_i32_0 : i32, i32
  }
  func.func @transform_2(%arg0: i32) -> (i32, i32) {
    %c0_i32 = arith.constant 0 : i32
    %c0_i32_0 = arith.constant 0 : i32
    %c0_i32_1 = arith.constant 0 : i32
    return %c0_i32, %c0_i32_0 : i32, i32
  }
  func.func @transform_3(%arg0: i32) -> (i32, i32) {
    %c0_i32 = arith.constant 0 : i32
    %c0_i32_0 = arith.constant 0 : i32
    return %arg0, %c0_i32 : i32, i32
  }
}

module attributes {stable_mosaic.version = 11 : i64} {
  func.func @_bn_silu_kernel(%arg0: i32, %arg1: memref<1x100x128xbf16, #tpu.memory_space<vmem>>, %arg2: memref<1x128xf32, #tpu.memory_space<vmem>>, %arg3: memref<1x128xf32, #tpu.memory_space<vmem>>, %arg4: memref<1x100x128xf32, #tpu.memory_space<vmem>>) attributes {dimension_semantics = [#tpu.dimension_semantics<parallel>], iteration_bounds = array<i64: 2>, scalar_prefetch = 0 : i64, scratch_operands = 0 : i64, tpu.core_type = #tpu.core_type<tc>, window_params = [{transform_indices = @transform_0, window_bounds = array<i64: 1, 100, 128>}, {pipeline_mode = #tpu.pipeline_mode<synchronous>, transform_indices = @transform_1, window_bounds = array<i64: 1, 128>}, {pipeline_mode = #tpu.pipeline_mode<synchronous>, transform_indices = @transform_2, window_bounds = array<i64: 1, 128>}, {transform_indices = @transform_3, window_bounds = array<i64: 1, 100, 128>}]} {
    %c0 = arith.constant 0 : index
    %c0_0 = arith.constant 0 : index
    %c0_1 = arith.constant 0 : index
    %0 = vector.load %arg1[%c0, %c0_0, %c0_1] : memref<1x100x128xbf16, #tpu.memory_space<vmem>>, vector<1x100x128xbf16>
    %1 = arith.extf %0 : vector<1x100x128xbf16> to vector<1x100x128xf32>
    %c0_2 = arith.constant 0 : index
    %c0_3 = arith.constant 0 : index
    %2 = vector.load %arg2[%c0_2, %c0_3] : memref<1x128xf32, #tpu.memory_space<vmem>>, vector<1x128xf32>
    %3 = vector.shape_cast %2 : vector<1x128xf32> to vector<1x1x128xf32>
    %4 = vector.broadcast %3 : vector<1x1x128xf32> to vector<1x100x128xf32>
    %5 = arith.mulf %1, %4 : vector<1x100x128xf32>
    %c0_4 = arith.constant 0 : index
    %c0_5 = arith.constant 0 : index
    %6 = vector.load %arg3[%c0_4, %c0_5] : memref<1x128xf32, #tpu.memory_space<vmem>>, vector<1x128xf32>
    %7 = vector.shape_cast %6 : vector<1x128xf32> to vector<1x1x128xf32>
    %8 = vector.broadcast %7 : vector<1x1x128xf32> to vector<1x100x128xf32>
    %9 = arith.addf %5, %8 : vector<1x100x128xf32>
    %10 = arith.negf %9 : vector<1x100x128xf32>
    %11 = math.exp %10 : vector<1x100x128xf32>
    %cst = arith.constant 1.000000e+00 : f32
    %12 = vector.broadcast %cst : f32 to vector<1x100x128xf32>
    %13 = arith.addf %12, %11 : vector<1x100x128xf32>
    %14 = arith.divf %12, %13 : vector<1x100x128xf32>
    %15 = arith.mulf %9, %14 : vector<1x100x128xf32>
    %c0_6 = arith.constant 0 : index
    %c0_7 = arith.constant 0 : index
    %c0_8 = arith.constant 0 : index
    %16 = vector.load %arg4[%c0_6, %c0_7, %c0_8] : memref<1x100x128xf32, #tpu.memory_space<vmem>>, vector<1x100x128xf32>
    tpu.vector_store %arg4[%c0_6, %c0_7, %c0_8], %15 {strides = array<i32>} : memref<1x100x128xf32, #tpu.memory_space<vmem>>, vector<1x100x128xf32>,
    return
  }
  func.func @transform_0(%arg0: i32) -> (i32, i32, i32) {
    %c0_i32 = arith.constant 0 : i32
    %c0_i32_0 = arith.constant 0 : i32
    %c0_i32_1 = arith.constant 0 : i32
    return %arg0, %c0_i32, %c0_i32_0 : i32, i32, i32
  }
  func.func @transform_1(%arg0: i32) -> (i32, i32) {
    %c0_i32 = arith.constant 0 : i32
    %c0_i32_0 = arith.constant 0 : i32
    %c0_i32_1 = arith.constant 0 : i32
    return %c0_i32, %c0_i32_0 : i32, i32
  }
  func.func @transform_2(%arg0: i32) -> (i32, i32) {
    %c0_i32 = arith.constant 0 : i32
    %c0_i32_0 = arith.constant 0 : i32
    %c0_i32_1 = arith.constant 0 : i32
    return %c0_i32, %c0_i32_0 : i32, i32
  }
  func.func @transform_3(%arg0: i32) -> (i32, i32, i32) {
    %c0_i32 = arith.constant 0 : i32
    %c0_i32_0 = arith.constant 0 : i32
    %c0_i32_1 = arith.constant 0 : i32
    return %arg0, %c0_i32, %c0_i32_0 : i32, i32, i32
  }
}

module attributes {stable_mosaic.version = 11 : i64} {
  func.func @_conv3x3_fused_kernel(%arg0: i32, %arg1: memref<1x100x128xbf16, #tpu.memory_space<vmem>>, %arg2: memref<9x128x128xbf16, #tpu.memory_space<vmem>>, %arg3: memref<1x100xf32, #tpu.memory_space<vmem>>, %arg4: memref<1x100x128xbf16, #tpu.memory_space<vmem>>, %arg5: memref<8x128xf32, #tpu.memory_space<vmem>>, %arg6: memref<100x128xf32, #tpu.memory_space<vmem>>) attributes {dimension_semantics = [#tpu.dimension_semantics<parallel>], iteration_bounds = array<i64: 2>, scalar_prefetch = 0 : i64, scratch_operands = 1 : i64, tpu.core_type = #tpu.core_type<tc>, window_params = [{transform_indices = @transform_0, window_bounds = array<i64: 1, 100, 128>}, {pipeline_mode = #tpu.pipeline_mode<synchronous>, transform_indices = @transform_1, window_bounds = array<i64: 9, 128, 128>}, {pipeline_mode = #tpu.pipeline_mode<synchronous>, transform_indices = @transform_2, window_bounds = array<i64: 1, 100>}, {transform_indices = @transform_3, window_bounds = array<i64: 1, 100, 128>}, {transform_indices = @transform_4, window_bounds = array<i64: 8, 128>}]} {
    %c0 = arith.constant 0 : index
    %c0_0 = arith.constant 0 : index
    %c0_1 = arith.constant 0 : index
    %0 = vector.load %arg1[%c0, %c0_0, %c0_1] : memref<1x100x128xbf16, #tpu.memory_space<vmem>>, vector<1x100x128xbf16>
    %1 = vector.shape_cast %0 : vector<1x100x128xbf16> to vector<100x128xbf16>
    %cst = arith.constant 0.000000e+00 : f32
    %2 = vector.broadcast %cst : f32 to vector<100x128xf32>
    %c0_2 = arith.constant 0 : index
    %c0_3 = arith.constant 0 : index
    %3 = vector.load %arg6[%c0_2, %c0_3] : memref<100x128xf32, #tpu.memory_space<vmem>>, vector<100x128xf32>
    tpu.vector_store %arg6[%c0_2, %c0_3], %2 {strides = array<i32>} : memref<100x128xf32, #tpu.memory_space<vmem>>, vector<100x128xf32>,
    %c0_4 = arith.constant 0 : index
    %c0_5 = arith.constant 0 : index
    %c0_6 = arith.constant 0 : index
    %4 = vector.load %arg2[%c0_4, %c0_5, %c0_6] : memref<9x128x128xbf16, #tpu.memory_space<vmem>>, vector<1x128x128xbf16>
    %5 = vector.shape_cast %4 : vector<1x128x128xbf16> to vector<128x128xbf16>
    %cst_7 = arith.constant dense<0.000000e+00> : vector<100x128xf32>
    %6 = tpu.matmul %1, %5, %cst_7 {dimension_numbers = #tpu.dot_dimension_numbers<[1], [0], [0], [1], [0, 0, 1, 1], [], []>} : vector<100x128xbf16>, vector<128x128xbf16>, vector<100x128xf32> -> vector<100x128xf32>
    %c11 = arith.constant 11 : index
    %c0_8 = arith.constant 0 : index
    %7 = vector.load %arg6[%c11, %c0_8] : memref<100x128xf32, #tpu.memory_space<vmem>>, vector<89x128xf32>
    %8 = vector.extract_strided_slice %6 {offsets = [0, 0], sizes = [89, 128], strides = [1, 1]} : vector<100x128xf32> to vector<89x128xf32>
    %9 = arith.addf %7, %8 : vector<89x128xf32>
    %c11_9 = arith.constant 11 : index
    %c0_10 = arith.constant 0 : index
    %10 = vector.load %arg6[%c11_9, %c0_10] : memref<100x128xf32, #tpu.memory_space<vmem>>, vector<89x128xf32>
    tpu.vector_store %arg6[%c11_9, %c0_10], %9 {strides = array<i32>} : memref<100x128xf32, #tpu.memory_space<vmem>>, vector<89x128xf32>,
    %c1 = arith.constant 1 : index
    %c0_11 = arith.constant 0 : index
    %c0_12 = arith.constant 0 : index
    %11 = vector.load %arg2[%c1, %c0_11, %c0_12] : memref<9x128x128xbf16, #tpu.memory_space<vmem>>, vector<1x128x128xbf16>
    %12 = vector.shape_cast %11 : vector<1x128x128xbf16> to vector<128x128xbf16>
    %cst_13 = arith.constant dense<0.000000e+00> : vector<100x128xf32>
    %13 = tpu.matmul %1, %12, %cst_13 {dimension_numbers = #tpu.dot_dimension_numbers<[1], [0], [0], [1], [0, 0, 1, 1], [], []>} : vector<100x128xbf16>, vector<128x128xbf16>, vector<100x128xf32> -> vector<100x128xf32>
    %c10 = arith.constant 10 : index
    %c0_14 = arith.constant 0 : index
    %14 = vector.load %arg6[%c10, %c0_14] : memref<100x128xf32, #tpu.memory_space<vmem>>, vector<90x128xf32>
    %15 = vector.extract_strided_slice %13 {offsets = [0, 0], sizes = [90, 128], strides = [1, 1]} : vector<100x128xf32> to vector<90x128xf32>
    %16 = arith.addf %14, %15 : vector<90x128xf32>
    %c10_15 = arith.constant 10 : index
    %c0_16 = arith.constant 0 : index
    %17 = vector.load %arg6[%c10_15, %c0_16] : memref<100x128xf32, #tpu.memory_space<vmem>>, vector<90x128xf32>
    tpu.vector_store %arg6[%c10_15, %c0_16], %16 {strides = array<i32>} : memref<100x128xf32, #tpu.memory_space<vmem>>, vector<90x128xf32>,
    %c2 = arith.constant 2 : index
    %c0_17 = arith.constant 0 : index
    %c0_18 = arith.constant 0 : index
    %18 = vector.load %arg2[%c2, %c0_17, %c0_18] : memref<9x128x128xbf16, #tpu.memory_space<vmem>>, vector<1x128x128xbf16>
    %19 = vector.shape_cast %18 : vector<1x128x128xbf16> to vector<128x128xbf16>
    %cst_19 = arith.constant dense<0.000000e+00> : vector<100x128xf32>
    %20 = tpu.matmul %1, %19, %cst_19 {dimension_numbers = #tpu.dot_dimension_numbers<[1], [0], [0], [1], [0, 0, 1, 1], [], []>} : vector<100x128xbf16>, vector<128x128xbf16>, vector<100x128xf32> -> vector<100x128xf32>
    %c9 = arith.constant 9 : index
    %c0_20 = arith.constant 0 : index
    %21 = vector.load %arg6[%c9, %c0_20] : memref<100x128xf32, #tpu.memory_space<vmem>>, vector<91x128xf32>
    %22 = vector.extract_strided_slice %20 {offsets = [0, 0], sizes = [91, 128], strides = [1, 1]} : vector<100x128xf32> to vector<91x128xf32>
    %23 = arith.addf %21, %22 : vector<91x128xf32>
    %c9_21 = arith.constant 9 : index
    %c0_22 = arith.constant 0 : index
    %24 = vector.load %arg6[%c9_21, %c0_22] : memref<100x128xf32, #tpu.memory_space<vmem>>, vector<91x128xf32>
    tpu.vector_store %arg6[%c9_21, %c0_22], %23 {strides = array<i32>} : memref<100x128xf32, #tpu.memory_space<vmem>>, vector<91x128xf32>,
    %c3 = arith.constant 3 : index
    %c0_23 = arith.constant 0 : index
    %c0_24 = arith.constant 0 : index
    %25 = vector.load %arg2[%c3, %c0_23, %c0_24] : memref<9x128x128xbf16, #tpu.memory_space<vmem>>, vector<1x128x128xbf16>
    %26 = vector.shape_cast %25 : vector<1x128x128xbf16> to vector<128x128xbf16>
    %cst_25 = arith.constant dense<0.000000e+00> : vector<100x128xf32>
    %27 = tpu.matmul %1, %26, %cst_25 {dimension_numbers = #tpu.dot_dimension_numbers<[1], [0], [0], [1], [0, 0, 1, 1], [], []>} : vector<100x128xbf16>, vector<128x128xbf16>, vector<100x128xf32> -> vector<100x128xf32>
    %c1_26 = arith.constant 1 : index
    %c0_27 = arith.constant 0 : index
    %28 = vector.load %arg6[%c1_26, %c0_27] : memref<100x128xf32, #tpu.memory_space<vmem>>, vector<99x128xf32>
    %29 = vector.extract_strided_slice %27 {offsets = [0, 0], sizes = [99, 128], strides = [1, 1]} : vector<100x128xf32> to vector<99x128xf32>
    %30 = arith.addf %28, %29 : vector<99x128xf32>
    %c1_28 = arith.constant 1 : index
    %c0_29 = arith.constant 0 : index
    %31 = vector.load %arg6[%c1_28, %c0_29] : memref<100x128xf32, #tpu.memory_space<vmem>>, vector<99x128xf32>
    tpu.vector_store %arg6[%c1_28, %c0_29], %30 {strides = array<i32>} : memref<100x128xf32, #tpu.memory_space<vmem>>, vector<99x128xf32>,
    %c4 = arith.constant 4 : index
    %c0_30 = arith.constant 0 : index
    %c0_31 = arith.constant 0 : index
    %32 = vector.load %arg2[%c4, %c0_30, %c0_31] : memref<9x128x128xbf16, #tpu.memory_space<vmem>>, vector<1x128x128xbf16>
    %33 = vector.shape_cast %32 : vector<1x128x128xbf16> to vector<128x128xbf16>
    %cst_32 = arith.constant dense<0.000000e+00> : vector<100x128xf32>
    %34 = tpu.matmul %1, %33, %cst_32 {dimension_numbers = #tpu.dot_dimension_numbers<[1], [0], [0], [1], [0, 0, 1, 1], [], []>} : vector<100x128xbf16>, vector<128x128xbf16>, vector<100x128xf32> -> vector<100x128xf32>
    %c0_33 = arith.constant 0 : index
    %c0_34 = arith.constant 0 : index
    %35 = vector.load %arg6[%c0_33, %c0_34] : memref<100x128xf32, #tpu.memory_space<vmem>>, vector<100x128xf32>
    %36 = arith.addf %35, %34 : vector<100x128xf32>
    %c0_35 = arith.constant 0 : index
    %c0_36 = arith.constant 0 : index
    %37 = vector.load %arg6[%c0_35, %c0_36] : memref<100x128xf32, #tpu.memory_space<vmem>>, vector<100x128xf32>
    tpu.vector_store %arg6[%c0_35, %c0_36], %36 {strides = array<i32>} : memref<100x128xf32, #tpu.memory_space<vmem>>, vector<100x128xf32>,
    %c5 = arith.constant 5 : index
    %c0_37 = arith.constant 0 : index
    %c0_38 = arith.constant 0 : index
    %38 = vector.load %arg2[%c5, %c0_37, %c0_38] : memref<9x128x128xbf16, #tpu.memory_space<vmem>>, vector<1x128x128xbf16>
    %39 = vector.shape_cast %38 : vector<1x128x128xbf16> to vector<128x128xbf16>
    %cst_39 = arith.constant dense<0.000000e+00> : vector<100x128xf32>
    %40 = tpu.matmul %1, %39, %cst_39 {dimension_numbers = #tpu.dot_dimension_numbers<[1], [0], [0], [1], [0, 0, 1, 1], [], []>} : vector<100x128xbf16>, vector<128x128xbf16>, vector<100x128xf32> -> vector<100x128xf32>
    %c0_40 = arith.constant 0 : index
    %c0_41 = arith.constant 0 : index
    %41 = vector.load %arg6[%c0_40, %c0_41] : memref<100x128xf32, #tpu.memory_space<vmem>>, vector<99x128xf32>
    %42 = vector.extract_strided_slice %40 {offsets = [1, 0], sizes = [99, 128], strides = [1, 1]} : vector<100x128xf32> to vector<99x128xf32>
    %43 = arith.addf %41, %42 : vector<99x128xf32>
    %c0_42 = arith.constant 0 : index
    %c0_43 = arith.constant 0 : index
    %44 = vector.load %arg6[%c0_42, %c0_43] : memref<100x128xf32, #tpu.memory_space<vmem>>, vector<99x128xf32>
    tpu.vector_store %arg6[%c0_42, %c0_43], %43 {strides = array<i32>} : memref<100x128xf32, #tpu.memory_space<vmem>>, vector<99x128xf32>,
    %c6 = arith.constant 6 : index
    %c0_44 = arith.constant 0 : index
    %c0_45 = arith.constant 0 : index
    %45 = vector.load %arg2[%c6, %c0_44, %c0_45] : memref<9x128x128xbf16, #tpu.memory_space<vmem>>, vector<1x128x128xbf16>
    %46 = vector.shape_cast %45 : vector<1x128x128xbf16> to vector<128x128xbf16>
    %cst_46 = arith.constant dense<0.000000e+00> : vector<100x128xf32>
    %47 = tpu.matmul %1, %46, %cst_46 {dimension_numbers = #tpu.dot_dimension_numbers<[1], [0], [0], [1], [0, 0, 1, 1], [], []>} : vector<100x128xbf16>, vector<128x128xbf16>, vector<100x128xf32> -> vector<100x128xf32>
    %c0_47 = arith.constant 0 : index
    %c0_48 = arith.constant 0 : index
    %48 = vector.load %arg6[%c0_47, %c0_48] : memref<100x128xf32, #tpu.memory_space<vmem>>, vector<91x128xf32>
    %49 = vector.extract_strided_slice %47 {offsets = [9, 0], sizes = [91, 128], strides = [1, 1]} : vector<100x128xf32> to vector<91x128xf32>
    %50 = arith.addf %48, %49 : vector<91x128xf32>
    %c0_49 = arith.constant 0 : index
    %c0_50 = arith.constant 0 : index
    %51 = vector.load %arg6[%c0_49, %c0_50] : memref<100x128xf32, #tpu.memory_space<vmem>>, vector<91x128xf32>
    tpu.vector_store %arg6[%c0_49, %c0_50], %50 {strides = array<i32>} : memref<100x128xf32, #tpu.memory_space<vmem>>, vector<91x128xf32>,
    %c7 = arith.constant 7 : index
    %c0_51 = arith.constant 0 : index
    %c0_52 = arith.constant 0 : index
    %52 = vector.load %arg2[%c7, %c0_51, %c0_52] : memref<9x128x128xbf16, #tpu.memory_space<vmem>>, vector<1x128x128xbf16>
    %53 = vector.shape_cast %52 : vector<1x128x128xbf16> to vector<128x128xbf16>
    %cst_53 = arith.constant dense<0.000000e+00> : vector<100x128xf32>
    %54 = tpu.matmul %1, %53, %cst_53 {dimension_numbers = #tpu.dot_dimension_numbers<[1], [0], [0], [1], [0, 0, 1, 1], [], []>} : vector<100x128xbf16>, vector<128x128xbf16>, vector<100x128xf32> -> vector<100x128xf32>
    %c0_54 = arith.constant 0 : index
    %c0_55 = arith.constant 0 : index
    %55 = vector.load %arg6[%c0_54, %c0_55] : memref<100x128xf32, #tpu.memory_space<vmem>>, vector<90x128xf32>
    %56 = vector.extract_strided_slice %54 {offsets = [10, 0], sizes = [90, 128], strides = [1, 1]} : vector<100x128xf32> to vector<90x128xf32>
    %57 = arith.addf %55, %56 : vector<90x128xf32>
    %c0_56 = arith.constant 0 : index
    %c0_57 = arith.constant 0 : index
    %58 = vector.load %arg6[%c0_56, %c0_57] : memref<100x128xf32, #tpu.memory_space<vmem>>, vector<90x128xf32>
    tpu.vector_store %arg6[%c0_56, %c0_57], %57 {strides = array<i32>} : memref<100x128xf32, #tpu.memory_space<vmem>>, vector<90x128xf32>,
    %c8 = arith.constant 8 : index
    %c0_58 = arith.constant 0 : index
    %c0_59 = arith.constant 0 : index
    %59 = vector.load %arg2[%c8, %c0_58, %c0_59] : memref<9x128x128xbf16, #tpu.memory_space<vmem>>, vector<1x128x128xbf16>
    %60 = vector.shape_cast %59 : vector<1x128x128xbf16> to vector<128x128xbf16>
    %cst_60 = arith.constant dense<0.000000e+00> : vector<100x128xf32>
    %61 = tpu.matmul %1, %60, %cst_60 {dimension_numbers = #tpu.dot_dimension_numbers<[1], [0], [0], [1], [0, 0, 1, 1], [], []>} : vector<100x128xbf16>, vector<128x128xbf16>, vector<100x128xf32> -> vector<100x128xf32>
    %c0_61 = arith.constant 0 : index
    %c0_62 = arith.constant 0 : index
    %62 = vector.load %arg6[%c0_61, %c0_62] : memref<100x128xf32, #tpu.memory_space<vmem>>, vector<89x128xf32>
    %63 = vector.extract_strided_slice %61 {offsets = [11, 0], sizes = [89, 128], strides = [1, 1]} : vector<100x128xf32> to vector<89x128xf32>
    %64 = arith.addf %62, %63 : vector<89x128xf32>
    %c0_63 = arith.constant 0 : index
    %c0_64 = arith.constant 0 : index
    %65 = vector.load %arg6[%c0_63, %c0_64] : memref<100x128xf32, #tpu.memory_space<vmem>>, vector<89x128xf32>
    tpu.vector_store %arg6[%c0_63, %c0_64], %64 {strides = array<i32>} : memref<100x128xf32, #tpu.memory_space<vmem>>, vector<89x128xf32>,
    %c0_65 = arith.constant 0 : index
    %c0_66 = arith.constant 0 : index
    %66 = vector.load %arg6[%c0_65, %c0_66] : memref<100x128xf32, #tpu.memory_space<vmem>>, vector<100x128xf32>
    %c0_67 = arith.constant 0 : index
    %c0_68 = arith.constant 0 : index
    %67 = vector.load %arg3[%c0_67, %c0_68] : memref<1x100xf32, #tpu.memory_space<vmem>>, vector<1x100xf32>
    %cst_69 = arith.constant dense<0.000000e+00> : vector<1x128xf32>
    %68 = tpu.matmul %67, %66, %cst_69 {dimension_numbers = #tpu.dot_dimension_numbers<[1], [0], [0], [1], [0, 0, 1, 1], [], []>} : vector<1x100xf32>, vector<100x128xf32>, vector<1x128xf32> -> vector<1x128xf32>
    %c0_70 = arith.constant 0 : index
    %c0_71 = arith.constant 0 : index
    %69 = vector.load %arg5[%c0_70, %c0_71] : memref<8x128xf32, #tpu.memory_space<vmem>>, vector<1x128xf32>
    tpu.vector_store %arg5[%c0_70, %c0_71], %68 {strides = array<i32>} : memref<8x128xf32, #tpu.memory_space<vmem>>, vector<1x128xf32>,
    %70 = arith.mulf %66, %66 : vector<100x128xf32>
    %cst_72 = arith.constant dense<0.000000e+00> : vector<1x128xf32>
    %71 = tpu.matmul %67, %70, %cst_72 {dimension_numbers = #tpu.dot_dimension_numbers<[1], [0], [0], [1], [0, 0, 1, 1], [], []>} : vector<1x100xf32>, vector<100x128xf32>, vector<1x128xf32> -> vector<1x128xf32>
    %c1_73 = arith.constant 1 : index
    %c0_74 = arith.constant 0 : index
    %72 = vector.load %arg5[%c1_73, %c0_74] : memref<8x128xf32, #tpu.memory_space<vmem>>, vector<1x128xf32>
    tpu.vector_store %arg5[%c1_73, %c0_74], %71 {strides = array<i32>} : memref<8x128xf32, #tpu.memory_space<vmem>>, vector<1x128xf32>,
    %73 = arith.truncf %66 : vector<100x128xf32> to vector<100x128xbf16>
    %c0_75 = arith.constant 0 : index
    %c0_76 = arith.constant 0 : index
    %c0_77 = arith.constant 0 : index
    %74 = vector.load %arg4[%c0_75, %c0_76, %c0_77] : memref<1x100x128xbf16, #tpu.memory_space<vmem>>, vector<1x100x128xbf16>
    %75 = vector.shape_cast %74 : vector<1x100x128xbf16> to vector<100x128xbf16>
    %76 = vector.shape_cast %73 : vector<100x128xbf16> to vector<1x100x128xbf16>
    tpu.vector_store %arg4[%c0_75, %c0_76, %c0_77], %76 {strides = array<i32>} : memref<1x100x128xbf16, #tpu.memory_space<vmem>>, vector<1x100x128xbf16>,
    return
  }
  func.func @transform_0(%arg0: i32) -> (i32, i32, i32) {
    %c0_i32 = arith.constant 0 : i32
    %c0_i32_0 = arith.constant 0 : i32
    %c0_i32_1 = arith.constant 0 : i32
    return %arg0, %c0_i32, %c0_i32_0 : i32, i32, i32
  }
  func.func @transform_1(%arg0: i32) -> (i32, i32, i32) {
    %c0_i32 = arith.constant 0 : i32
    %c0_i32_0 = arith.constant 0 : i32
    %c0_i32_1 = arith.constant 0 : i32
    %c0_i32_2 = arith.constant 0 : i32
    return %c0_i32, %c0_i32_0, %c0_i32_1 : i32, i32, i32
  }
  func.func @transform_2(%arg0: i32) -> (i32, i32) {
    %c0_i32 = arith.constant 0 : i32
    %c0_i32_0 = arith.constant 0 : i32
    %c0_i32_1 = arith.constant 0 : i32
    return %c0_i32, %c0_i32_0 : i32, i32
  }
  func.func @transform_3(%arg0: i32) -> (i32, i32, i32) {
    %c0_i32 = arith.constant 0 : i32
    %c0_i32_0 = arith.constant 0 : i32
    %c0_i32_1 = arith.constant 0 : i32
    return %arg0, %c0_i32, %c0_i32_0 : i32, i32, i32
  }
  func.func @transform_4(%arg0: i32) -> (i32, i32) {
    %c0_i32 = arith.constant 0 : i32
    %c0_i32_0 = arith.constant 0 : i32
    return %arg0, %c0_i32 : i32, i32
  }
}

</mosaic_0001>

<bundles_post_ra>
// kernel: encoder_block_forward.5
= control target key start
LH: loop header
LB: loop body
LE: loop exit
PB: predicated region body
PF: predicated region fallthrough
CT: control target
= control target key end

     0   :  { %s519_s12 = smov 0   ;;  %s549_s0 = inlined_call_operand.vmem [shape: bf16[128,128], index: 0, kind: input, shape index: {}]   ;;  %s550_s1 = inlined_call_operand.vmem [shape: f32[1,128], index: 1, kind: input, shape index: {}]   ;;  %s551_s2 = inlined_call_operand.vmem [shape: f32[1,128], index: 2, kind: input, shape index: {}]   ;;  %s552_s3 = inlined_call_operand.vmem [shape: bf16[128,128], index: 3, kind: output, shape index: {}]  }
   0x1 LB: > { %s372_s13 = sadd.s32 4294967295, %s497_s12   ;;  %p376_p0 = scmp.ge.s32.totalorder %s497_s12, 1  ;;  %s497_s12 = sphi %s519_s12, %s13_s12  }
   0x2   : > { %p138_p1 = scmp.lt.s32.totalorder %s497_s12, 3 }
   0x4   : > { %p139_p2 = pnand %p376_p0, %p138_p1 }
   0x5   : > { %s377_s14 = sshll.u32 (!%p139_p2), %s372_s13, 3 }
   0x6   : > { %142 = sbr.rel (%p139_p2) target bundleno = 65 (0x41), region = 32  ;;  %p163_p3 = scmp.lt.s32.totalorder (!%p139_p2), %s377_s14, 15 }
   0xb   : > { %s554_s14 = smov (!%p163_p3, %s377_s14), 15  ;;  %v381_v0 = vld [vmem:[%s550_s1] ss:$0 sm:$0xff] }
   0xc   : > { %s378_s15 = sshll.u32 %s554_s14, 2  ;;  %v382_v9 = vld [vmem:[%s551_s2] ss:$0 sm:$0xff] }
   0xd   : > { %s166_s18 = scalar_lea.vmem %s549_s0, %s378_s15  ;;  %s172_s25 = scalar_lea.vmem %s552_s3, %s378_s15 }
   0xe   : > { %v410_v1 = vld [vmem:[%s166_s18] sm:$0xff]   ;;  %v445_v2 = vld [vmem:[%s166_s18 + $0x8] sm:$0xff]   ;;  %v446_v3 = vld [vmem:[%s166_s18 + $0x10] sm:$0xff]  }
   0xf   : > { %v411_v4 = vunpack.c.l.bf16 %v410_v1  ;;  %v412_v5 = vunpack.c.h.bf16 %v410_v1  ;;  %v447_v6 = vld [vmem:[%s166_s18 + $0x18] sm:$0xff]   ;;  %v415_v7 = vunpack.c.l.bf16 %v445_v2  ;;  %v416_v8 = vunpack.c.h.bf16 %v445_v2 }
  0x10   : > { %v419_v10 = vunpack.c.l.bf16 %v446_v3  ;;  %v420_v11 = vunpack.c.h.bf16 %v446_v3  ;;  %v423_v12 = vunpack.c.l.bf16 %v447_v6  ;;  %v424_v13 = vunpack.c.h.bf16 %v447_v6 }
  0x11   : > { %v197_v14 = vmul.f32 %v411_v4, %v381_v0  ;;  %v198_v15 = vmul.f32 %v412_v5, %v381_v0  ;;  %v199_v16 = vmul.f32 %v415_v7, %v381_v0  ;;  %v200_v17 = vmul.f32 %v416_v8, %v381_v0 }
  0x12   : > { %v201_v18 = vmul.f32 %v419_v10, %v381_v0  ;;  %v202_v19 = vmul.f32 %v420_v11, %v381_v0  ;;  %v203_v20 = vmul.f32 %v423_v12, %v381_v0  ;;  %v204_v21 = vmul.f32 %v424_v13, %v381_v0 }
  0x13   : > { %v212_v22 = vadd.f32 %v382_v9, %v197_v14  ;;  %v213_v23 = vadd.f32 %v382_v9, %v198_v15  ;;  %v214_v24 = vadd.f32 %v382_v9, %v199_v16  ;;  %v215_v25 = vadd.f32 %v382_v9, %v200_v17 }
  0x14   : > { %v216_v26 = vadd.f32 %v382_v9, %v201_v18  ;;  %v217_v27 = vadd.f32 %v382_v9, %v202_v19  ;;  %v218_v31 = vadd.f32 %v382_v9, %v203_v20  ;;  %v219_v33 = vadd.f32 %v382_v9, %v204_v21 }
  0x15   : > { %v383_v28 = vmul.f32 -1.442695, %v212_v22  ;;  %v384_v29 = vmul.f32 -1.442695, %v213_v23  ;;  %v385_v30 = vmul.f32 -1.442695, %v214_v24 }
  0x16   : > { %v386_v32 = vmul.f32 -1.442695, %v215_v25  ;;  %v387_v34 = vmul.f32 -1.442695, %v216_v26  ;;  %v388_v35 = vmul.f32 -1.442695, %v217_v27 }
  0x17   : > { %459 = vpow2.f32 %v383_v28  ;;  %v389_v36 = vmul.f32 -1.442695, %v218_v31  ;;  %v390_v37 = vmul.f32 -1.442695, %v219_v33 }
  0x18   : > { %461 = vpow2.f32 %v384_v29 }
  0x19   : > { %463 = vpow2.f32 %v385_v30 }
  0x1a   : > { %465 = vpow2.f32 %v386_v32 }
  0x1b   : > { %467 = vpow2.f32 %v387_v34 }
  0x1c   : > { %469 = vpow2.f32 %v388_v35 }
  0x1d   : > { %471 = vpow2.f32 %v389_v36 }
  0x1e   : > { %473 = vpow2.f32 %v390_v37 }
  0x24   : > { %v460_v38 = vpop.eup %459 }
  0x25   : > { %v462_v39 = vpop.eup %461  ;;  %v244_v40 = vadd.f32 1.0, %v460_v38 }
  0x26   : > { %v464_v41 = vpop.eup %463  ;;  %v245_v42 = vadd.f32 1.0, %v462_v39 }
  0x27   : > { %v466_v43 = vpop.eup %465  ;;  %475 = vrcp.f32 %v244_v40  ;;  %v246_v44 = vadd.f32 1.0, %v464_v41 }
  0x28   : > { %v468_v45 = vpop.eup %467  ;;  %477 = vrcp.f32 %v245_v42  ;;  %v247_v46 = vadd.f32 1.0, %v466_v43 }
  0x29   : > { %v470_v47 = vpop.eup %469  ;;  %479 = vrcp.f32 %v246_v44  ;;  %v248_v48 = vadd.f32 1.0, %v468_v45 }
  0x2a   : > { %v472_v49 = vpop.eup %471  ;;  %481 = vrcp.f32 %v247_v46  ;;  %v249_v50 = vadd.f32 1.0, %v470_v47 }
  0x2b   : > { %v474_v51 = vpop.eup %473  ;;  %483 = vrcp.f32 %v248_v48  ;;  %v250_v52 = vadd.f32 1.0, %v472_v49 }
  0x2c   : > { %485 = vrcp.f32 %v249_v50  ;;  %v251_v53 = vadd.f32 1.0, %v474_v51 }
  0x2d   : > { %487 = vrcp.f32 %v250_v52 }
  0x2e   : > { %489 = vrcp.f32 %v251_v53 }
  0x34   : > { %v476_v54 = vpop.eup %475 }
  0x35   : > { %v478_v55 = vpop.eup %477  ;;  %v268_v56 = vmul.f32 %v476_v54, %v212_v22 }
  0x36   : > { %v480_v57 = vpop.eup %479  ;;  %v269_v58 = vmul.f32 %v478_v55, %v213_v23 }
  0x37   : > { %v482_v59 = vpop.eup %481  ;;  %v270_v60 = vmul.f32 %v480_v57, %v214_v24 }
  0x38   : > { %v484_v61 = vpop.eup %483  ;;  %v428_v62 = vpack.c.bf16 %v269_v58, %v268_v56  ;;  %v271_v63 = vmul.f32 %v482_v59, %v215_v25 }
  0x39   : > { %v486_v0 = vpop.eup %485  ;;  %v272_v1 = vmul.f32 %v484_v61, %v216_v26 }
  0x3a   : > { %v488_v2 = vpop.eup %487  ;;  %429 = vst [vmem:[%s172_s25] sm:$0xff] %v428_v62   ;;  %v433_v3 = vpack.c.bf16 %v271_v63, %v270_v60  ;;  %v273_v4 = vmul.f32 %v486_v0, %v217_v27 }
  0x3b   : > { %v490_v5 = vpop.eup %489  ;;  %v274_v6 = vmul.f32 %v488_v2, %v218_v31 }
  0x3c   : > { %448 = vst [vmem:[%s172_s25 + $0x8] sm:$0xff] %v433_v3   ;;  %v438_v7 = vpack.c.bf16 %v273_v4, %v272_v1  ;;  %v275_v8 = vmul.f32 %v490_v5, %v219_v33 }
  0x3e   : > { %449 = vst [vmem:[%s172_s25 + $0x10] sm:$0xff] %v438_v7   ;;  %v443_v9 = vpack.c.bf16 %v275_v8, %v274_v6 }
  0x40   : > { %450 = vst [vmem:[%s172_s25 + $0x18] sm:$0xff] %v443_v9  }
  0x41 PF: > { %s13_s12 = sadd.s32 1, %s497_s12  }
  0x42   : > { %p10_p4 = scmp.ge.s32.totalorder %s13_s12, 4  }
  0x44   :  { %12 = sbr.rel (!%p10_p4) target bundleno = 1 (0x1), region = 62 }

// kernel: encoder_block_forward.4
= control target key start
LH: loop header
LB: loop body
LE: loop exit
PB: predicated region body
PF: predicated region fallthrough
CT: control target
= control target key end

     0   :  { %s673_s12 = smov 0   ;;  %s735_s0 = inlined_call_operand.vmem [shape: bf16[128,128], index: 0, kind: input, shape index: {}]   ;;  %s736_s1 = inlined_call_operand.vmem [shape: bf16[128,128], index: 1, kind: input, shape index: {}]   ;;  %s737_s2 = inlined_call_operand.vmem [shape: bf16[128,128], index: 2, kind: output, shape index: {0}]   ;;  %s738_s3 = inlined_call_operand.vmem [shape: f32[16,128], index: 3, kind: output, shape index: {1}]  }
   0x1 LB: > { %s679_s13 = sadd.s32 4294967295, %s651_s12   ;;  %p514_p0 = scmp.ge.s32.totalorder %s651_s12, 1  ;;  %s651_s12 = sphi %s673_s12, %s14_s12  }
   0x2   : > { %p141_p1 = scmp.lt.s32.totalorder %s651_s12, 3 }
   0x4   : > { %p142_p2 = pnand %p514_p0, %p141_p1 }
   0x5   : > { %s515_s16 = sshll.u32 (!%p142_p2), %s679_s13, 3  ;;  %p181_p4 = scmp.lt.s32.totalorder (!%p142_p2), %s679_s13, 1 }
   0x6   : > { %145 = sbr.rel (%p142_p2) target bundleno = 272 (0x110), region = 28  ;;  %p170_p3 = scmp.lt.s32.totalorder (!%p142_p2), %s515_s16, 15 }
   0xb   : > { %v633_v0 = vld [vmem:[%s736_s1 + $0x38] sm:$0xff]   ;;  %v634_v1 = vld [vmem:[%s736_s1 + $0x30] sm:$0xff]   ;;  %s740_s16 = smov (!%p170_p3, %s515_s16), 15  ;;  %v635_v2 = vld [vmem:[%s736_s1 + $0x28] sm:$0xff]   ;;  %s742_s13 = smov (!%p181_p4, %s679_s13), 1 }
   0xc   : > { %585 = vmatprep.subr.bf16.mxu0 %v633_v0  ;;  %609 = vmatprep.subr.bf16.mxu1 %v633_v0  ;;  %s516_s21 = sshll.u32 %s740_s16, 2  ;;  %v636_v3 = vld [vmem:[%s736_s1 + $0x20] sm:$0xff]   ;;  %v637_v6 = vld [vmem:[%s736_s1 + $0x18] sm:$0xff]   ;;  %v638_v7 = vld [vmem:[%s736_s1 + $0x10] sm:$0xff]   ;;  %s519_s11 = sshll.u32 %s742_s13, 3 }
   0xd   : > { %586 = vmatpush3.bf16.msra.mxu0 %v633_v0  ;;  %617 = vmatpush3.bf16.msra.mxu1 %v633_v0  ;;  %s701_s24 = scalar_lea.vmem %s735_s0, %s516_s21  ;;  %v639_v8 = vld [vmem:[%s736_s1 + $0x8] sm:$0xff]   ;;  %v640_v9 = vld [vmem:[%s736_s1] sm:$0xff]   ;;  %s179_s10 = scalar_lea.vmem %s737_s2, %s516_s21 }
   0xe   : > { %587 = vmatprep.subr.bf16.mxu0 %v634_v1  ;;  %610 = vmatprep.subr.bf16.mxu1 %v634_v1  ;;  %v641_v4 = vld [vmem:[%s701_s24] sm:$0xff]   ;;  %v643_v5 = vld [vmem:[%s701_s24 + $0x10] sm:$0xff]   ;;  %v642_v10 = vld [vmem:[%s701_s24 + $0x8] sm:$0xff]   ;;  %s184_s16 = scalar_lea.vmem %s738_s3, %s519_s11 }
   0xf   : > { %601 = vmatprep.mubr.bf16.mxu0 %v641_v4  ;;  %605 = vmatprep.mubr.bf16.mxu1 %v643_v5  ;;  %v644_v11 = vld [vmem:[%s701_s24 + $0x18] sm:$0xff]  }
  0x11   : > { %588 = vmatpush3.bf16.msra.mxu0 %v634_v1  ;;  %618 = vmatpush3.bf16.msra.mxu1 %v634_v1 }
  0x12   : > { %589 = vmatprep.subr.bf16.mxu0 %v635_v2  ;;  %611 = vmatprep.subr.bf16.mxu1 %v635_v2 }
  0x15   : > { %590 = vmatpush3.bf16.msra.mxu0 %v635_v2  ;;  %619 = vmatpush3.bf16.msra.mxu1 %v635_v2 }
  0x16   : > { %591 = vmatprep.subr.bf16.mxu0 %v636_v3  ;;  %612 = vmatprep.subr.bf16.mxu1 %v636_v3 }
  0x19   : > { %592 = vmatpush3.bf16.msra.mxu0 %v636_v3  ;;  %620 = vmatpush3.bf16.msra.mxu1 %v636_v3 }
  0x1a   : > { %593 = vmatprep.subr.bf16.mxu0 %v637_v6  ;;  %613 = vmatprep.subr.bf16.mxu1 %v637_v6 }
  0x1d   : > { %594 = vmatpush3.bf16.msra.mxu0 %v637_v6  ;;  %621 = vmatpush3.bf16.msra.mxu1 %v637_v6 }
  0x1e   : > { %595 = vmatprep.subr.bf16.mxu0 %v638_v7  ;;  %614 = vmatprep.subr.bf16.mxu1 %v638_v7 }
  0x21   : > { %596 = vmatpush3.bf16.msra.mxu0 %v638_v7  ;;  %622 = vmatpush3.bf16.msra.mxu1 %v638_v7 }
  0x22   : > { %597 = vmatprep.subr.bf16.mxu0 %v639_v8  ;;  %615 = vmatprep.subr.bf16.mxu1 %v639_v8 }
  0x25   : > { %598 = vmatpush3.bf16.msra.mxu0 %v639_v8  ;;  %623 = vmatpush3.bf16.msra.mxu1 %v639_v8 }
  0x26   : > { %599 = vmatprep.subr.bf16.mxu0 %v640_v9  ;;  %616 = vmatprep.subr.bf16.mxu1 %v640_v9 }
  0x29   : > { %600 = vmatpush3.bf16.msra.mxu0 %v640_v9  ;;  %624 = vmatpush3.bf16.msra.mxu1 %v640_v9 }
  0x2c   : > { %602 = vmatmul.mubr.bf16.vlgmr.msra.gmra.mxu0 %v642_v10  ;;  %606 = vmatmul.mubr.bf16.vlgmr.msra.gmra.mxu1 %v644_v11 }
  0xec   : > { %v603_v12 = vpop.f32.mrf.mxu0  ;;  %v607_v13 = vpop.f32.mrf.mxu1 }
  0xed   : > { %v363_v27 = vmul.f32 %v603_v12, %v603_v12  ;;  %v367_v39 = vmul.f32 %v607_v13, %v607_v13 }
  0xee   : > { %v316_v14 = vpop.f32.mrf.mxu0  ;;  %v332_v15 = vpop.f32.mrf.mxu1 }
  0xef   : > { %v361_v22 = vmul.f32 %v316_v14, %v316_v14  ;;  %v365_v33 = vmul.f32 %v332_v15, %v332_v15 }
  0xf0   : > { %v604_v16 = vpop.f32.mrf.mxu0  ;;  %v608_v17 = vpop.f32.mrf.mxu1 }
  0xf1   : > { %v558_v18 = vpack.c.bf16 %v604_v16, %v603_v12  ;;  %v568_v19 = vpack.c.bf16 %v608_v17, %v607_v13  ;;  %v364_v30 = vmul.f32 %v604_v16, %v604_v16  ;;  %v368_v42 = vmul.f32 %v608_v17, %v608_v17 }
  0xf2   : > { %v319_v20 = vpop.f32.mrf.mxu0  ;;  %v335_v21 = vpop.f32.mrf.mxu1 }
  0xf3   : > { %570 = vst [vmem:[%s179_s10 + $0x8] sm:$0xff] %v558_v18   ;;  %v347_v23 = vadd.f32 %v319_v20, %v316_v14  ;;  %v362_v24 = vmul.f32 %v319_v20, %v319_v20  ;;  %v553_v25 = vpack.c.bf16 %v319_v20, %v316_v14  ;;  %572 = vst [vmem:[%s179_s10 + $0x18] sm:$0xff] %v568_v19  }
  0xf4   : > { %v563_v26 = vpack.c.bf16 %v335_v21, %v332_v15  ;;  %v366_v37 = vmul.f32 %v335_v21, %v335_v21 }
  0xf5   : > { %v348_v28 = vadd.f32 %v603_v12, %v347_v23  ;;  %v369_v29 = vadd.f32 %v362_v24, %v361_v22  ;;  %554 = vst [vmem:[%s179_s10] sm:$0xff] %v553_v25  }
  0xf6   : > { %571 = vst [vmem:[%s179_s10 + $0x10] sm:$0xff] %v563_v26  }
  0xf7   : > { %v370_v31 = vadd.f32 %v369_v29, %v363_v27  ;;  %v349_v32 = vadd.f32 %v604_v16, %v348_v28 }
  0xf9   : > { %v350_v34 = vadd.f32 %v349_v32, %v332_v15  ;;  %v371_v35 = vadd.f32 %v370_v31, %v364_v30 }
  0xfb   : > { %v351_v36 = vadd.f32 %v350_v34, %v335_v21  ;;  %v372_v38 = vadd.f32 %v371_v35, %v365_v33 }
  0xfd   : > { %v352_v40 = vadd.f32 %v607_v13, %v351_v36  ;;  %v373_v41 = vadd.f32 %v372_v38, %v366_v37 }
  0xff   : > { %v353_v43 = vadd.f32 %v608_v17, %v352_v40  ;;  %v374_v44 = vadd.f32 %v373_v41, %v367_v39 }
 0x101   : > { %v354_v45 = vrot.slane %v353_v43, 4  ;;  %v375_v46 = vadd.f32 %v374_v44, %v368_v42 }
 0x103   : > { %v355_v47 = vadd.f32 %v354_v45, %v353_v43  ;;  %v376_v48 = vrot.slane %v375_v46, 4 }
 0x105   : > { %v356_v49 = vrot.slane %v355_v47, 2  ;;  %v377_v50 = vadd.f32 %v376_v48, %v375_v46 }
 0x107   : > { %v357_v51 = vadd.f32 %v356_v49, %v355_v47  ;;  %v378_v52 = vrot.slane %v377_v50, 2 }
 0x109   : > { %v358_v53 = vrot.slane %v357_v51, 1  ;;  %v379_v54 = vadd.f32 %v378_v52, %v377_v50 }
 0x10b   : > { %v359_v55 = vadd.f32 %v358_v53, %v357_v51  ;;  %v380_v56 = vrot.slane %v379_v54, 1 }
 0x10d   : > { %360 = vst [vmem:[%s184_s16] sm:$0x1] %v359_v55  ;;  %v381_v57 = vadd.f32 %v380_v56, %v379_v54 }
 0x10f   : > { %382 = vst [vmem:[%s184_s16 + $0x1] sm:$0x1] %v381_v57 }
 0x110 PF: > { %s14_s12 = sadd.s32 1, %s651_s12  }
 0x111   : > { %p11_p5 = scmp.ge.s32.totalorder %s14_s12, 4  }
 0x113   :  { %13 = sbr.rel (!%p11_p5) target bundleno = 1 (0x1), region = 70 }

// kernel: encoder_block_forward.7
= control target key start
LH: loop header
LB: loop body
LE: loop exit
PB: predicated region body
PF: predicated region fallthrough
CT: control target
= control target key end

     0   :  { %s539_s12 = smov 0   ;;  %s642_s0 = inlined_call_operand.vmem [shape: bf16[2,100,128], index: 0, kind: input, shape index: {}]   ;;  %s643_s1 = inlined_call_operand.vmem [shape: f32[1,128], index: 1, kind: input, shape index: {}]   ;;  %s644_s2 = inlined_call_operand.vmem [shape: f32[1,128], index: 2, kind: input, shape index: {}]   ;;  %s645_s3 = inlined_call_operand.vmem [shape: f32[2,100,128], index: 3, kind: output, shape index: {}]  }
   0x1 LB: > { %s396_s13 = sadd.s32 4294967295, %s517_s12   ;;  %p400_p0 = scmp.ge.s32.totalorder %s517_s12, 1  ;;  %s517_s12 = sphi %s539_s12, %s13_s12  }
   0x2   : > { %p137_p1 = scmp.lt.s32.totalorder %s517_s12, 3 }
   0x4   : > { %p138_p2 = pnand %p400_p0, %p137_p1 }
   0x5   : > { %p161_p3 = scmp.lt.s32.totalorder (!%p138_p2), %s396_s13, 1 }
   0x6   : > { %141 = sbr.rel (%p138_p2) target bundleno = 69 (0x45), region = 32 }
   0xb   : > { %s647_s13 = smov (!%p161_p3, %s396_s13), 1  ;;  %v403_v0 = vld [vmem:[%s643_s1] ss:$0 sm:$0xff] }
   0xc   : > { %s449_s14 = smul.u32 52, %s647_s13  ;;  %v404_v9 = vld [vmem:[%s644_s2] ss:$0 sm:$0xff] }
   0xd   : > { %s450_s22 = smul.u32 104, %s647_s13 }
   0xe   : > { %s553_s17 = scalar_lea.vmem %s642_s0, %s449_s14 }
   0xf   : > { %v421_v1 = vld [vmem:[%s553_s17] sm:$0xff]   ;;  %v444_v2 = vld [vmem:[%s553_s17 + $0x8] sm:$0xff]   ;;  %v445_v3 = vld [vmem:[%s553_s17 + $0x10] sm:$0xff]   ;;  %s611_s25 = scalar_lea.vmem %s645_s3, %s450_s22 }
  0x10   : > { %v422_v4 = vunpack.c.l.bf16 %v421_v1  ;;  %v423_v5 = vunpack.c.h.bf16 %v421_v1  ;;  %v426_v6 = vunpack.c.l.bf16 %v444_v2  ;;  %v427_v7 = vunpack.c.h.bf16 %v444_v2  ;;  %v446_v8 = vld [vmem:[%s553_s17 + $0x18] sm:$0xff]   ;;  %v447_v22 = vld [vmem:[%s553_s17 + $0x20] sm:$0xff]   ;;  %v448_v31 = vld [vmem:[%s553_s17 + $0x28] sm:$0xff]  }
  0x11   : > { %v430_v10 = vunpack.c.l.bf16 %v445_v3  ;;  %v431_v11 = vunpack.c.h.bf16 %v445_v3  ;;  %v434_v12 = vunpack.c.l.bf16 %v446_v8  ;;  %v435_v13 = vunpack.c.h.bf16 %v446_v8  ;;  %v183_v39 = vld [vmem:[%s553_s17 + $0x30] sm:$0x3] }
  0x12   : > { %v204_v14 = vmul.f32 %v422_v4, %v403_v0  ;;  %v205_v15 = vmul.f32 %v423_v5, %v403_v0  ;;  %v206_v16 = vmul.f32 %v426_v6, %v403_v0  ;;  %v207_v17 = vmul.f32 %v427_v7, %v403_v0 }
  0x13   : > { %v208_v18 = vmul.f32 %v430_v10, %v403_v0  ;;  %v209_v19 = vmul.f32 %v431_v11, %v403_v0  ;;  %v210_v20 = vmul.f32 %v434_v12, %v403_v0  ;;  %v211_v21 = vmul.f32 %v435_v13, %v403_v0 }
  0x14   : > { %v566_v23 = vadd.f32 %v404_v9, %v204_v14  ;;  %v568_v24 = vadd.f32 %v404_v9, %v205_v15  ;;  %v570_v25 = vadd.f32 %v404_v9, %v206_v16  ;;  %v572_v26 = vadd.f32 %v404_v9, %v207_v17 }
  0x15   : > { %v574_v27 = vadd.f32 %v404_v9, %v208_v18  ;;  %v576_v28 = vadd.f32 %v404_v9, %v209_v19  ;;  %v578_v29 = vadd.f32 %v404_v9, %v210_v20  ;;  %v580_v30 = vadd.f32 %v404_v9, %v211_v21 }
  0x16   : > { %v405_v32 = vmul.f32 -1.442695, %v566_v23  ;;  %v406_v33 = vmul.f32 -1.442695, %v568_v24  ;;  %v407_v34 = vmul.f32 -1.442695, %v570_v25  ;;  %v438_v35 = vunpack.c.l.bf16 %v447_v22 }
  0x17   : > { %v408_v36 = vmul.f32 -1.442695, %v572_v26  ;;  %v409_v37 = vmul.f32 -1.442695, %v574_v27  ;;  %v439_v38 = vunpack.c.h.bf16 %v447_v22  ;;  %v410_v40 = vmul.f32 -1.442695, %v576_v28 }
  0x18   : > { %459 = vpow2.f32 %v405_v32  ;;  %v411_v41 = vmul.f32 -1.442695, %v578_v29  ;;  %v212_v42 = vmul.f32 %v438_v35, %v403_v0  ;;  %v442_v44 = vunpack.c.l.bf16 %v448_v31 }
  0x19   : > { %461 = vpow2.f32 %v406_v33  ;;  %v213_v43 = vmul.f32 %v439_v38, %v403_v0  ;;  %v443_v45 = vunpack.c.h.bf16 %v448_v31  ;;  %v412_v46 = vmul.f32 -1.442695, %v580_v30 }
  0x1a   : > { %463 = vpow2.f32 %v407_v34  ;;  %v592_v47 = vadd.f32 %v404_v9, %v212_v42  ;;  %v196_v48 = vunpack.c.l.bf16 %v183_v39  ;;  %v214_v50 = vmul.f32 %v442_v44, %v403_v0 }
  0x1b   : > { %465 = vpow2.f32 %v408_v36  ;;  %v594_v49 = vadd.f32 %v404_v9, %v213_v43  ;;  %v215_v51 = vmul.f32 %v443_v45, %v403_v0 }
  0x1c   : > { %467 = vpow2.f32 %v409_v37  ;;  %v413_v52 = vmul.f32 -1.442695, %v592_v47  ;;  %v216_v53 = vmul.f32 %v403_v0, %v196_v48  ;;  %v598_v55 = vadd.f32 %v404_v9, %v214_v50 }
  0x1d   : > { %469 = vpow2.f32 %v410_v40  ;;  %v414_v54 = vmul.f32 -1.442695, %v594_v49  ;;  %v600_v56 = vadd.f32 %v404_v9, %v215_v51 }
  0x1e   : > { %471 = vpow2.f32 %v411_v41  ;;  %v602_v57 = vadd.f32 %v404_v9, %v216_v53  ;;  %v415_v58 = vmul.f32 -1.442695, %v598_v55 }
  0x1f   : > { %473 = vpow2.f32 %v412_v46  ;;  %v416_v59 = vmul.f32 -1.442695, %v600_v56 }
  0x20   : > { %475 = vpow2.f32 %v413_v52  ;;  %v417_v60 = vmul.f32 -1.442695, %v602_v57 }
  0x21   : > { %477 = vpow2.f32 %v414_v54 }
  0x22   : > { %479 = vpow2.f32 %v415_v58 }
  0x23   : > { %481 = vpow2.f32 %v416_v59 }
  0x24   : > { %483 = vpow2.f32 %v417_v60 }
  0x25   : > { %v460_v61 = vpop.eup %459 }
  0x26   : > { %v462_v62 = vpop.eup %461  ;;  %v276_v63 = vadd.f32 1.0, %v460_v61 }
  0x27   : > { %v464_v0 = vpop.eup %463  ;;  %v277_v1 = vadd.f32 1.0, %v462_v62 }
  0x28   : > { %v466_v2 = vpop.eup %465  ;;  %485 = vrcp.f32 %v276_v63  ;;  %v278_v3 = vadd.f32 1.0, %v464_v0 }
  0x29   : > { %v468_v4 = vpop.eup %467  ;;  %487 = vrcp.f32 %v277_v1  ;;  %v279_v5 = vadd.f32 1.0, %v466_v2 }
  0x2a   : > { %v470_v6 = vpop.eup %469  ;;  %489 = vrcp.f32 %v278_v3  ;;  %v280_v7 = vadd.f32 1.0, %v468_v4 }
  0x2b   : > { %v472_v8 = vpop.eup %471  ;;  %491 = vrcp.f32 %v279_v5  ;;  %v281_v9 = vadd.f32 1.0, %v470_v6 }
  0x2c   : > { %v474_v10 = vpop.eup %473  ;;  %493 = vrcp.f32 %v280_v7  ;;  %v282_v11 = vadd.f32 1.0, %v472_v8 }
  0x2d   : > { %v476_v12 = vpop.eup %475  ;;  %495 = vrcp.f32 %v281_v9  ;;  %v283_v13 = vadd.f32 1.0, %v474_v10 }
  0x2e   : > { %v478_v14 = vpop.eup %477  ;;  %497 = vrcp.f32 %v282_v11  ;;  %v284_v15 = vadd.f32 1.0, %v476_v12 }
  0x2f   : > { %v480_v16 = vpop.eup %479  ;;  %499 = vrcp.f32 %v283_v13  ;;  %v285_v17 = vadd.f32 1.0, %v478_v14 }
  0x30   : > { %v482_v18 = vpop.eup %481  ;;  %501 = vrcp.f32 %v284_v15  ;;  %v286_v19 = vadd.f32 1.0, %v480_v16 }
  0x31   : > { %v484_v20 = vpop.eup %483  ;;  %503 = vrcp.f32 %v285_v17  ;;  %v287_v21 = vadd.f32 1.0, %v482_v18 }
  0x32   : > { %505 = vrcp.f32 %v286_v19  ;;  %v288_v22 = vadd.f32 1.0, %v484_v20 }
  0x33   : > { %507 = vrcp.f32 %v287_v21 }
  0x34   : > { %509 = vrcp.f32 %v288_v22 }
  0x35   : > { %v486_v31 = vpop.eup %485 }
  0x36   : > { %v488_v32 = vpop.eup %487  ;;  %v315_v33 = vmul.f32 %v486_v31, %v566_v23 }
  0x37   : > { %v490_v34 = vpop.eup %489  ;;  %v316_v35 = vmul.f32 %v488_v32, %v568_v24 }
  0x38   : > { %v492_v36 = vpop.eup %491  ;;  %328 = vst [vmem:[%s611_s25] sm:$0xff] %v315_v33  ;;  %v317_v37 = vmul.f32 %v490_v34, %v570_v25 }
  0x39   : > { %v494_v38 = vpop.eup %493  ;;  %329 = vst [vmem:[%s611_s25 + $0x8] sm:$0xff] %v316_v35  ;;  %v318_v39 = vmul.f32 %v492_v36, %v572_v26 }
  0x3a   : > { %v496_v40 = vpop.eup %495  ;;  %330 = vst [vmem:[%s611_s25 + $0x10] sm:$0xff] %v317_v37  ;;  %v319_v41 = vmul.f32 %v494_v38, %v574_v27 }
  0x3b   : > { %v498_v23 = vpop.eup %497  ;;  %331 = vst [vmem:[%s611_s25 + $0x18] sm:$0xff] %v318_v39  ;;  %v320_v24 = vmul.f32 %v496_v40, %v576_v28 }
  0x3c   : > { %v500_v42 = vpop.eup %499  ;;  %332 = vst [vmem:[%s611_s25 + $0x20] sm:$0xff] %v319_v41  ;;  %v321_v25 = vmul.f32 %v498_v23, %v578_v29 }
  0x3d   : > { %v502_v43 = vpop.eup %501  ;;  %333 = vst [vmem:[%s611_s25 + $0x28] sm:$0xff] %v320_v24  ;;  %v322_v26 = vmul.f32 %v500_v42, %v580_v30 }
  0x3e   : > { %v504_v44 = vpop.eup %503  ;;  %334 = vst [vmem:[%s611_s25 + $0x30] sm:$0xff] %v321_v25  ;;  %v323_v27 = vmul.f32 %v502_v43, %v592_v47 }
  0x3f   : > { %v506_v45 = vpop.eup %505  ;;  %335 = vst [vmem:[%s611_s25 + $0x38] sm:$0xff] %v322_v26  ;;  %v324_v28 = vmul.f32 %v504_v44, %v594_v49 }
  0x40   : > { %v508_v46 = vpop.eup %507  ;;  %336 = vst [vmem:[%s611_s25 + $0x40] sm:$0xff] %v323_v27  ;;  %v325_v48 = vmul.f32 %v506_v45, %v598_v55 }
  0x41   : > { %v510_v29 = vpop.eup %509  ;;  %337 = vst [vmem:[%s611_s25 + $0x48] sm:$0xff] %v324_v28  ;;  %v326_v50 = vmul.f32 %v508_v46, %v600_v56 }
  0x42   : > { %338 = vst [vmem:[%s611_s25 + $0x50] sm:$0xff] %v325_v48  ;;  %v327_v30 = vmul.f32 %v510_v29, %v602_v57 }
  0x43   : > { %339 = vst [vmem:[%s611_s25 + $0x58] sm:$0xff] %v326_v50 }
  0x44   : > { %340 = vst [vmem:[%s611_s25 + $0x60] sm:$0xf] %v327_v30 }
  0x45 PF: > { %s13_s12 = sadd.s32 1, %s517_s12  }
  0x46   : > { %p10_p4 = scmp.ge.s32.totalorder %s13_s12, 4  }
  0x48   :  { %12 = sbr.rel (!%p10_p4) target bundleno = 1 (0x1), region = 62 }

// kernel: encoder_block_forward.6
= control target key start
LH: loop header
LB: loop body
LE: loop exit
PB: predicated region body
PF: predicated region fallthrough
CT: control target
= control target key end

     0   :  { %s3531_s15 = smov 0   ;;  %s4352_s0 = inlined_call_operand.vmem [shape: bf16[2,100,128], index: 0, kind: input, shape index: {}]   ;;  %s4353_s1 = inlined_call_operand.vmem [shape: bf16[9,128,128], index: 1, kind: input, shape index: {}]   ;;  %s4354_s2 = inlined_call_operand.vmem [shape: f32[1,100], index: 2, kind: input, shape index: {}]   ;;  %s4355_s3 = inlined_call_operand.vmem [shape: bf16[2,100,128], index: 3, kind: output, shape index: {0}]   ;;  %s4356_s4 = inlined_call_operand.vmem [shape: f32[16,128], index: 4, kind: output, shape index: {1}]  }
   0x1 LB: > { %s2506_s16 = sadd.s32 4294967295, %s3502_s15   ;;  %p2510_p0 = scmp.ge.s32.totalorder %s3502_s15, 1  ;;  %s3502_s15 = sphi %s3531_s15, %s15_s15  }
   0x2   : > { %p165_p1 = scmp.lt.s32.totalorder %s3502_s15, 3 }
   0x4   : > { %p166_p2 = pnand %p2510_p0, %p165_p1 }
   0x5   : > { %p195_p3 = scmp.lt.s32.totalorder (!%p166_p2), %s2506_s16, 1 }
   0x6   : > { %169 = sbr.rel (%p166_p2) target bundleno = 765 (0x2fd), region = 32 }
   0xb   : > { %v3416_v0 = vld [vmem:[%s4353_s1 + $0x38] sm:$0xff]   ;;  %v3504_v1 = vmov 0.0   ;;  %v3418_v3 = vld [vmem:[%s4353_s1 + $0x30] sm:$0xff]   ;;  %vm3505_vm0 = vmmov 0   ;;  %v3420_v5 = vld [vmem:[%s4353_s1 + $0x28] sm:$0xff]   ;;  %s4358_s16 = smov (!%p195_p3, %s2506_s16), 1 }
   0xc   : > { %2951 = vmatprep.subr.bf16.mxu0 %v3504_v1  ;;  %223 = vst [vmem:[#allocation2] sm:$0xff] %v3504_v1  ;;  %224 = vst [vmem:[#allocation2 + $0x8] sm:$0xff] %v3504_v1  ;;  %2995 = vmatprep.subr.bf16.mxu1 %v3504_v1  ;;  %v3417_v2 = vld [vmem:[%s4353_s1 + $0x78] sm:$0xff]   ;;  %v3419_v4 = vld [vmem:[%s4353_s1 + $0x70] sm:$0xff]   ;;  %s3405_s5 = smul.u32 52, %s4358_s16  ;;  %vm1402_vm1 = vcmask 1046528  }
   0xd   : > { %225 = vst [vmem:[#allocation2 + $0x10] sm:$0xff] %v3504_v1  ;;  %226 = vst [vmem:[#allocation2 + $0x18] sm:$0xff] %v3504_v1  ;;  %2952 = vmatpush3.bf16.msra.mxu0 %v3416_v0  ;;  %2967 = vmatprep.mubr.msk.bf16.mxu0 %vm3505_vm0, %v3504_v1  ;;  %v3421_v6 = vld [vmem:[%s4353_s1 + $0x68] sm:$0xff]   ;;  %v3422_v7 = vld [vmem:[%s4353_s1 + $0x20] sm:$0xff]   ;;  %vm2192_vm2 = vcmask 1043456   ;;  %vm1878_vm3 = vcmask 1045504  }
   0xe   : > { %227 = vst [vmem:[#allocation2 + $0x20] sm:$0xff] %v3504_v1  ;;  %228 = vst [vmem:[#allocation2 + $0x28] sm:$0xff] %v3504_v1  ;;  %2953 = vmatprep.subr.bf16.mxu0 %v3504_v1  ;;  %2996 = vmatpush3.bf16.msra.mxu1 %v3417_v2  ;;  %v3423_v8 = vld [vmem:[%s4353_s1 + $0x60] sm:$0xff]   ;;  %v3424_v9 = vld [vmem:[%s4353_s1 + $0x18] sm:$0xff]   ;;  %s3603_s12 = scalar_lea.vmem %s4352_s0, %s3405_s5  ;;  %s4118_s29 = scalar_lea.vmem %s4355_s3, %s3405_s5  ;;  %vm2114_vm4 = vcmask 1044480   ;;  %vm2188_vm5 = vcmask 818176  }
   0xf   : > { %229 = vst [vmem:[#allocation2 + $0x30] sm:$0xff] %v3504_v1  ;;  %230 = vst [vmem:[#allocation2 + $0x38] sm:$0xff] %v3504_v1  ;;  %2997 = vmatprep.subr.bf16.mxu1 %v3504_v1  ;;  %3011 = vmatprep.mubr.msk.bf16.mxu1 %vm3505_vm0, %v3504_v1  ;;  %v3425_v10 = vld [vmem:[%s4353_s1 + $0x58] sm:$0xff]   ;;  %v3426_v11 = vld [vmem:[%s4353_s1 + $0x10] sm:$0xff]   ;;  %s2513_s6 = sshll.u32 %s4358_s16, 3 }
  0x10   : > { %231 = vst [vmem:[#allocation2 + $0x40] sm:$0xff] %v3504_v1  ;;  %232 = vst [vmem:[#allocation2 + $0x48] sm:$0xff] %v3504_v1  ;;  %v3427_v12 = vld [vmem:[%s4353_s1 + $0x50] sm:$0xff]   ;;  %v3428_v13 = vld [vmem:[%s4353_s1 + $0x8] sm:$0xff]   ;;  %s208_s9 = scalar_lea.vmem %s4356_s4, %s2513_s6 }
  0x11   : > { %233 = vst [vmem:[#allocation2 + $0x50] sm:$0xff] %v3504_v1  ;;  %234 = vst [vmem:[#allocation2 + $0x58] sm:$0xff] %v3504_v1  ;;  %2954 = vmatpush3.bf16.msra.mxu0 %v3418_v3  ;;  %v3429_v14 = vld [vmem:[%s4353_s1 + $0x48] sm:$0xff]   ;;  %v3430_v15 = vld [vmem:[%s4353_s1] sm:$0xff]  }
  0x12   : > { %235 = vst [vmem:[#allocation2 + $0x60] sm:$0xf] %v3504_v1  ;;  %2955 = vmatprep.subr.bf16.mxu0 %v3504_v1  ;;  %2998 = vmatpush3.bf16.msra.mxu1 %v3419_v4  ;;  %v3432_v16 = vld [vmem:[%s4353_s1 + $0x40] sm:$0xff]   ;;  %v3436_v18 = vld [vmem:[%s4353_s1 + $0xb8] sm:$0xff]   ;;  %v3438_v20 = vld [vmem:[%s4353_s1 + $0xb0] sm:$0xff]  }
  0x13   : > { %2999 = vmatprep.subr.bf16.mxu1 %v3504_v1  ;;  %v3635_v17 = vld [vmem:[%s3603_s12] sm:$0xff]   ;;  %v3437_v19 = vld [vmem:[%s4353_s1 + $0xf8] sm:$0xff]   ;;  %v3440_v21 = vld [vmem:[%s4353_s1 + $0xf0] sm:$0xff]  }
  0x14   : > { %v3659_v22 = vld [vmem:[%s3603_s12 + $0x8] sm:$0xff]   ;;  %v3443_v25 = vld [vmem:[%s4353_s1 + $0xa0] sm:$0xff]   ;;  %v3684_v27 = vld [vmem:[%s3603_s12 + $0x10] sm:$0xff]  }
  0x15   : > { %2956 = vmatpush3.bf16.msra.mxu0 %v3420_v5  ;;  %v3441_v23 = vld [vmem:[%s4353_s1 + $0xa8] sm:$0xff]   ;;  %v3445_v26 = vld [vmem:[%s4353_s1 + $0xe0] sm:$0xff]   ;;  %v3446_v28 = vld [vmem:[%s4353_s1 + $0x98] sm:$0xff]  }
  0x16   : > { %2957 = vmatprep.subr.bf16.mxu0 %v3504_v1  ;;  %3000 = vmatpush3.bf16.msra.mxu1 %v3421_v6  ;;  %v3442_v24 = vld [vmem:[%s4353_s1 + $0xe8] sm:$0xff]   ;;  %v3447_v29 = vld [vmem:[%s4353_s1 + $0xd8] sm:$0xff]   ;;  %v3448_v30 = vld [vmem:[%s4353_s1 + $0x90] sm:$0xff]  }
  0x17   : > { %3001 = vmatprep.subr.bf16.mxu1 %v3504_v1  ;;  %v3450_v31 = vld [vmem:[%s4353_s1 + $0xd0] sm:$0xff]   ;;  %v3709_v32 = vld [vmem:[%s3603_s12 + $0x18] sm:$0xff]   ;;  %v3451_v33 = vld [vmem:[%s4353_s1 + $0x88] sm:$0xff]  }
  0x18   : > { %v3452_v34 = vld [vmem:[%s4353_s1 + $0xc8] sm:$0xff]   ;;  %v3453_v35 = vld [vmem:[%s4353_s1 + $0x80] sm:$0xff]   ;;  %v3755_v39 = vld [vmem:[%s3603_s12 + $0x30] ss:$0 sps:$4 sm:$0x33]  }
  0x19   : > { %2958 = vmatpush3.bf16.msra.mxu0 %v3422_v7  ;;  %v3454_v36 = vld [vmem:[%s4353_s1 + $0xc0] sm:$0xff]   ;;  %v3746_v38 = vld [vmem:[%s3603_s12 + $0x28] sm:$0xff]   ;;  %v3455_v40 = vld [vmem:[%s4353_s1 + $0x138] sm:$0xff]  }
  0x1a   : > { %2959 = vmatprep.subr.bf16.mxu0 %v3504_v1  ;;  %3002 = vmatpush3.bf16.msra.mxu1 %v3423_v8  ;;  %v3734_v37 = vld [vmem:[%s3603_s12 + $0x20] sm:$0xff]   ;;  %v3456_v41 = vld [vmem:[%s4353_s1 + $0x178] sm:$0xff]   ;;  %v3457_v42 = vld [vmem:[%s4353_s1 + $0x130] sm:$0xff]  }
  0x1b   : > { %3003 = vmatprep.subr.bf16.mxu1 %v3504_v1  ;;  %v3458_v43 = vld [vmem:[%s4353_s1 + $0x170] sm:$0xff]   ;;  %v3459_v44 = vld [vmem:[%s4353_s1 + $0x128] sm:$0xff]   ;;  %v3461_v46 = vld [vmem:[%s4353_s1 + $0x120] sm:$0xff]  }
  0x1c   : > { %v3460_v45 = vld [vmem:[%s4353_s1 + $0x168] sm:$0xff]   ;;  %v3462_v47 = vld [vmem:[%s4353_s1 + $0x160] sm:$0xff]   ;;  %v3463_v48 = vld [vmem:[%s4353_s1 + $0x118] sm:$0xff]  }
  0x1d   : > { %2960 = vmatpush3.bf16.msra.mxu0 %v3424_v9  ;;  %v3464_v49 = vld [vmem:[%s4353_s1 + $0x158] sm:$0xff]   ;;  %v3465_v50 = vld [vmem:[%s4353_s1 + $0x110] sm:$0xff]   ;;  %v3467_v52 = vld [vmem:[%s4353_s1 + $0x108] sm:$0xff]  }
  0x1e   : > { %2961 = vmatprep.subr.bf16.mxu0 %v3504_v1  ;;  %3004 = vmatpush3.bf16.msra.mxu1 %v3425_v10  ;;  %v3466_v51 = vld [vmem:[%s4353_s1 + $0x150] sm:$0xff]   ;;  %v3468_v53 = vld [vmem:[%s4353_s1 + $0x148] sm:$0xff]   ;;  %v3469_v54 = vld [vmem:[%s4353_s1 + $0x100] sm:$0xff]  }
  0x1f   : > { %3005 = vmatprep.subr.bf16.mxu1 %v3504_v1  ;;  %v3470_v55 = vld [vmem:[%s4353_s1 + $0x140] sm:$0xff]   ;;  %v3471_v56 = vld [vmem:[%s4353_s1 + $0x1b8] sm:$0xff]   ;;  %v3472_v58 = vld [vmem:[%s4353_s1 + $0x1b0] sm:$0xff]  }
  0x20   : > { %v3474_v57 = vld [vmem:[%s4353_s1 + $0x1f8] sm:$0xff]   ;;  %v3476_v59 = vld [vmem:[%s4353_s1 + $0x1f0] sm:$0xff]   ;;  %v3473_v60 = vld [vmem:[%s4353_s1 + $0x1a8] sm:$0xff]  }
  0x21   : > { %2962 = vmatpush3.bf16.msra.mxu0 %v3426_v11  ;;  %v3478_v61 = vld [vmem:[%s4353_s1 + $0x1e8] sm:$0xff]   ;;  %v3475_v62 = vld [vmem:[%s4353_s1 + $0x1a0] sm:$0xff]   ;;  %v3477_v0 = vld [vmem:[%s4353_s1 + $0x198] sm:$0xff]  }
  0x22   : > { %2963 = vmatprep.subr.bf16.mxu0 %v3504_v1  ;;  %3006 = vmatpush3.bf16.msra.mxu1 %v3427_v12  ;;  %v3480_v63 = vld [vmem:[%s4353_s1 + $0x1e0] sm:$0xff]   ;;  %v3482_v2 = vld [vmem:[%s4353_s1 + $0x1d8] sm:$0xff]   ;;  %v3479_v3 = vld [vmem:[%s4353_s1 + $0x190] sm:$0xff]  }
  0x23   : > { %3007 = vmatprep.subr.bf16.mxu1 %v3504_v1  ;;  %v3484_v4 = vld [vmem:[%s4353_s1 + $0x1d0] sm:$0xff]   ;;  %v3481_v5 = vld [vmem:[%s4353_s1 + $0x188] sm:$0xff]   ;;  %v3483_v7 = vld [vmem:[%s4353_s1 + $0x180] sm:$0xff]  }
  0x24   : > { %v3485_v6 = vld [vmem:[%s4353_s1 + $0x1c8] sm:$0xff]   ;;  %v3486_v8 = vld [vmem:[%s4353_s1 + $0x1c0] sm:$0xff]   ;;  %v3487_v9 = vld [vmem:[%s4353_s1 + $0x238] sm:$0xff]  }
  0x25   : > { %2964 = vmatpush3.bf16.msra.mxu0 %v3428_v13  ;;  %v3488_v10 = vld [vmem:[%s4353_s1 + $0x230] sm:$0xff]   ;;  %v3489_v11 = vld [vmem:[%s4353_s1 + $0x228] sm:$0xff]   ;;  %v3490_v12 = vld [vmem:[%s4353_s1 + $0x220] sm:$0xff]  }
  0x26   : > { %2965 = vmatprep.subr.bf16.mxu0 %v3504_v1  ;;  %3008 = vmatpush3.bf16.msra.mxu1 %v3429_v14  ;;  %v3491_v13 = vld [vmem:[%s4353_s1 + $0x218] sm:$0xff]   ;;  %v3492_v14 = vld [vmem:[%s4353_s1 + $0x210] sm:$0xff]  }
  0x27   : > { %3009 = vmatprep.subr.bf16.mxu1 %v3504_v1 }
  0x29   : > { %2966 = vmatpush3.bf16.msra.mxu0 %v3430_v15  ;;  %v427_v15 = vld [vmem:[#allocation2 + $0xb] sm:$0xff] }
  0x2a   : > { %3010 = vmatpush3.bf16.msra.mxu1 %v3432_v16  ;;  %3039 = vmatprep.subr.bf16.mxu0 %v3504_v1  ;;  %v3493_v16 = vld [vmem:[%s4353_s1 + $0x208] sm:$0xff]  }
  0x2b   : > { %3083 = vmatprep.subr.bf16.mxu1 %v3504_v1 }
  0x2c   : > { %2968 = vmatmul.mubr.bf16.vlgmr.msra.gmra.mxu0 %v3635_v17 }
  0x2d   : > { %3012 = vmatmul.mubr.bf16.vlgmr.msra.gmra.mxu1 %v3635_v17  ;;  %2971 = vmatprep.mubr.msk.bf16.mxu0 %vm3505_vm0, %v3504_v1 }
  0x2e   : > { %3015 = vmatprep.mubr.msk.bf16.mxu1 %vm3505_vm0, %v3504_v1  ;;  %3040 = vmatpush3.bf16.msra.mxu0 %v3436_v18 }
  0x2f   : > { %3041 = vmatprep.subr.bf16.mxu0 %v3504_v1  ;;  %3084 = vmatpush3.bf16.msra.mxu1 %v3437_v19 }
  0x30   : > { %3085 = vmatprep.subr.bf16.mxu1 %v3504_v1 }
  0x32   : > { %3042 = vmatpush3.bf16.msra.mxu0 %v3438_v20 }
  0x33   : > { %3043 = vmatprep.subr.bf16.mxu0 %v3504_v1  ;;  %3086 = vmatpush3.bf16.msra.mxu1 %v3440_v21 }
  0x34   : > { %2972 = vmatmul.mubr.bf16.gmra.mxu0 %v3659_v22  ;;  %3087 = vmatprep.subr.bf16.mxu1 %v3504_v1 }
  0x35   : > { %3016 = vmatmul.mubr.bf16.gmra.mxu1 %v3659_v22  ;;  %2975 = vmatprep.mubr.msk.bf16.mxu0 %vm3505_vm0, %v3504_v1 }
  0x36   : > { %3019 = vmatprep.mubr.msk.bf16.mxu1 %vm3505_vm0, %v3504_v1  ;;  %3044 = vmatpush3.bf16.msra.mxu0 %v3441_v23  ;;  %v428_v23 = vld [vmem:[#allocation2 + $0x13] sm:$0xff] }
  0x37   : > { %3045 = vmatprep.subr.bf16.mxu0 %v3504_v1  ;;  %3088 = vmatpush3.bf16.msra.mxu1 %v3442_v24  ;;  %v3494_v24 = vld [vmem:[%s4353_s1 + $0x200] sm:$0xff]  }
  0x38   : > { %3089 = vmatprep.subr.bf16.mxu1 %v3504_v1 }
  0x3a   : > { %3046 = vmatpush3.bf16.msra.mxu0 %v3443_v25 }
  0x3b   : > { %3047 = vmatprep.subr.bf16.mxu0 %v3504_v1  ;;  %3090 = vmatpush3.bf16.msra.mxu1 %v3445_v26 }
  0x3c   : > { %2976 = vmatmul.mubr.bf16.gmra.mxu0 %v3684_v27  ;;  %3091 = vmatprep.subr.bf16.mxu1 %v3504_v1 }
  0x3d   : > { %3020 = vmatmul.mubr.bf16.gmra.mxu1 %v3684_v27  ;;  %2979 = vmatprep.mubr.msk.bf16.mxu0 %vm3505_vm0, %v3504_v1 }
  0x3e   : > { %3023 = vmatprep.mubr.msk.bf16.mxu1 %vm3505_vm0, %v3504_v1  ;;  %3048 = vmatpush3.bf16.msra.mxu0 %v3446_v28 }
  0x3f   : > { %3049 = vmatprep.subr.bf16.mxu0 %v3504_v1  ;;  %3092 = vmatpush3.bf16.msra.mxu1 %v3447_v29 }
  0x40   : > { %3093 = vmatprep.subr.bf16.mxu1 %v3504_v1 }
  0x42   : > { %3050 = vmatpush3.bf16.msra.mxu0 %v3448_v30 }
  0x43   : > { %3051 = vmatprep.subr.bf16.mxu0 %v3504_v1  ;;  %3094 = vmatpush3.bf16.msra.mxu1 %v3450_v31  ;;  %v429_v31 = vld [vmem:[#allocation2 + $0x1b] sm:$0xff] }
  0x44   : > { %2980 = vmatmul.mubr.bf16.gmra.mxu0 %v3709_v32  ;;  %3095 = vmatprep.subr.bf16.mxu1 %v3504_v1 }
  0x45   : > { %3024 = vmatmul.mubr.bf16.gmra.mxu1 %v3709_v32  ;;  %2983 = vmatprep.mubr.msk.bf16.mxu0 %vm3505_vm0, %v3504_v1 }
  0x46   : > { %3027 = vmatprep.mubr.msk.bf16.mxu1 %vm3505_vm0, %v3504_v1  ;;  %3052 = vmatpush3.bf16.msra.mxu0 %v3451_v33 }
  0x47   : > { %3053 = vmatprep.subr.bf16.mxu0 %v3504_v1  ;;  %3096 = vmatpush3.bf16.msra.mxu1 %v3452_v34 }
  0x48   : > { %3097 = vmatprep.subr.bf16.mxu1 %v3504_v1 }
  0x4a   : > { %3054 = vmatpush3.bf16.msra.mxu0 %v3453_v35 }
  0x4b   : > { %3098 = vmatpush3.bf16.msra.mxu1 %v3454_v36  ;;  %3127 = vmatprep.subr.bf16.mxu0 %v3504_v1 }
  0x4c   : > { %2984 = vmatmul.mubr.bf16.gmra.mxu0 %v3734_v37  ;;  %3171 = vmatprep.subr.bf16.mxu1 %v3504_v1 }
  0x4d   : > { %3028 = vmatmul.mubr.bf16.gmra.mxu1 %v3734_v37  ;;  %2987 = vmatprep.mubr.msk.bf16.mxu0 %vm3505_vm0, %v3504_v1 }
  0x4e   : > { %3031 = vmatprep.mubr.msk.bf16.mxu1 %vm3505_vm0, %v3504_v1 }
  0x54   : > { %2988 = vmatmul.mubr.bf16.gmra.mxu0 %v3746_v38 }
  0x55   : > { %3032 = vmatmul.mubr.bf16.gmra.mxu1 %v3746_v38  ;;  %2991 = vmatprep.mubr.msk.bf16.mxu0 %vm3505_vm0, %v3504_v1 }
  0x56   : > { %3035 = vmatprep.mubr.msk.bf16.mxu1 %vm3505_vm0, %v3504_v1 }
  0x5c   : > { %2992 = vmatmul.mubr.bf16.gmra.mxu0 %v3755_v39 }
  0x5d   : > { %3036 = vmatmul.mubr.bf16.gmra.mxu1 %v3755_v39  ;;  %3055 = vmatprep.mubr.msk.bf16.mxu0 %vm3505_vm0, %v3504_v1 }
  0x5e   : > { %3099 = vmatprep.mubr.msk.bf16.mxu1 %vm3505_vm0, %v3504_v1 }
  0x64   : > { %3056 = vmatmul.mubr.bf16.vlgmr.msra.gmra.mxu0 %v3635_v17 }
  0x65   : > { %3100 = vmatmul.mubr.bf16.vlgmr.msra.gmra.mxu1 %v3635_v17  ;;  %3059 = vmatprep.mubr.msk.bf16.mxu0 %vm3505_vm0, %v3504_v1 }
  0x66   : > { %3103 = vmatprep.mubr.msk.bf16.mxu1 %vm3505_vm0, %v3504_v1  ;;  %3128 = vmatpush3.bf16.msra.mxu0 %v3455_v40  ;;  %v4031_v40 = vld [vmem:[#allocation2] sm:$0xff] }
  0x67   : > { %3129 = vmatprep.subr.bf16.mxu0 %v3504_v1  ;;  %3172 = vmatpush3.bf16.msra.mxu1 %v3456_v41 }
  0x68   : > { %3173 = vmatprep.subr.bf16.mxu1 %v3504_v1 }
  0x6a   : > { %3130 = vmatpush3.bf16.msra.mxu0 %v3457_v42  ;;  %v430_v42 = vld [vmem:[#allocation2 + $0x23] sm:$0xff] }
  0x6b   : > { %3131 = vmatprep.subr.bf16.mxu0 %v3504_v1  ;;  %3174 = vmatpush3.bf16.msra.mxu1 %v3458_v43 }
  0x6c   : > { %3060 = vmatmul.mubr.bf16.gmra.mxu0 %v3659_v22  ;;  %3175 = vmatprep.subr.bf16.mxu1 %v3504_v1 }
  0x6d   : > { %3104 = vmatmul.mubr.bf16.gmra.mxu1 %v3659_v22  ;;  %3063 = vmatprep.mubr.msk.bf16.mxu0 %vm3505_vm0, %v3504_v1 }
  0x6e   : > { %3107 = vmatprep.mubr.msk.bf16.mxu1 %vm3505_vm0, %v3504_v1  ;;  %3132 = vmatpush3.bf16.msra.mxu0 %v3459_v44 }
  0x6f   : > { %3133 = vmatprep.subr.bf16.mxu0 %v3504_v1  ;;  %3176 = vmatpush3.bf16.msra.mxu1 %v3460_v45 }
  0x70   : > { %3177 = vmatprep.subr.bf16.mxu1 %v3504_v1 }
  0x72   : > { %3134 = vmatpush3.bf16.msra.mxu0 %v3461_v46 }
  0x73   : > { %3135 = vmatprep.subr.bf16.mxu0 %v3504_v1  ;;  %3178 = vmatpush3.bf16.msra.mxu1 %v3462_v47 }
  0x74   : > { %3064 = vmatmul.mubr.bf16.gmra.mxu0 %v3684_v27  ;;  %3179 = vmatprep.subr.bf16.mxu1 %v3504_v1 }
  0x75   : > { %3108 = vmatmul.mubr.bf16.gmra.mxu1 %v3684_v27  ;;  %3067 = vmatprep.mubr.msk.bf16.mxu0 %vm3505_vm0, %v3504_v1 }
  0x76   : > { %3111 = vmatprep.mubr.msk.bf16.mxu1 %vm3505_vm0, %v3504_v1  ;;  %3136 = vmatpush3.bf16.msra.mxu0 %v3463_v48 }
  0x77   : > { %3137 = vmatprep.subr.bf16.mxu0 %v3504_v1  ;;  %3180 = vmatpush3.bf16.msra.mxu1 %v3464_v49 }
  0x78   : > { %3181 = vmatprep.subr.bf16.mxu1 %v3504_v1 }
  0x7a   : > { %3138 = vmatpush3.bf16.msra.mxu0 %v3465_v50  ;;  %v431_v50 = vld [vmem:[#allocation2 + $0x2b] sm:$0xff] }
  0x7b   : > { %3139 = vmatprep.subr.bf16.mxu0 %v3504_v1  ;;  %3182 = vmatpush3.bf16.msra.mxu1 %v3466_v51 }
  0x7c   : > { %3068 = vmatmul.mubr.bf16.gmra.mxu0 %v3709_v32  ;;  %3183 = vmatprep.subr.bf16.mxu1 %v3504_v1 }
  0x7d   : > { %3112 = vmatmul.mubr.bf16.gmra.mxu1 %v3709_v32  ;;  %3071 = vmatprep.mubr.msk.bf16.mxu0 %vm3505_vm0, %v3504_v1 }
  0x7e   : > { %3115 = vmatprep.mubr.msk.bf16.mxu1 %vm3505_vm0, %v3504_v1  ;;  %3140 = vmatpush3.bf16.msra.mxu0 %v3467_v52 }
  0x7f   : > { %3141 = vmatprep.subr.bf16.mxu0 %v3504_v1  ;;  %3184 = vmatpush3.bf16.msra.mxu1 %v3468_v53 }
  0x80   : > { %3185 = vmatprep.subr.bf16.mxu1 %v3504_v1 }
  0x82   : > { %3142 = vmatpush3.bf16.msra.mxu0 %v3469_v54 }
  0x83   : > { %3186 = vmatpush3.bf16.msra.mxu1 %v3470_v55  ;;  %3215 = vmatprep.subr.bf16.mxu0 %v3504_v1 }
  0x84   : > { %3072 = vmatmul.mubr.bf16.gmra.mxu0 %v3734_v37  ;;  %3259 = vmatprep.subr.bf16.mxu1 %v3504_v1 }
  0x85   : > { %3116 = vmatmul.mubr.bf16.gmra.mxu1 %v3734_v37  ;;  %3075 = vmatprep.mubr.msk.bf16.mxu0 %vm3505_vm0, %v3504_v1 }
  0x86   : > { %3119 = vmatprep.mubr.msk.bf16.mxu1 %vm3505_vm0, %v3504_v1 }
  0x8c   : > { %3076 = vmatmul.mubr.bf16.gmra.mxu0 %v3746_v38 }
  0x8d   : > { %3120 = vmatmul.mubr.bf16.gmra.mxu1 %v3746_v38  ;;  %3079 = vmatprep.mubr.msk.bf16.mxu0 %vm3505_vm0, %v3504_v1 }
  0x8e   : > { %3123 = vmatprep.mubr.msk.bf16.mxu1 %vm3505_vm0, %v3504_v1 }
  0x94   : > { %3080 = vmatmul.mubr.bf16.gmra.mxu0 %v3755_v39 }
  0x95   : > { %3124 = vmatmul.mubr.bf16.gmra.mxu1 %v3755_v39  ;;  %3143 = vmatprep.mubr.msk.bf16.mxu0 %vm3505_vm0, %v3504_v1 }
  0x96   : > { %3187 = vmatprep.mubr.msk.bf16.mxu1 %vm3505_vm0, %v3504_v1 }
  0x9c   : > { %3144 = vmatmul.mubr.bf16.vlgmr.msra.gmra.mxu0 %v3635_v17 }
  0x9d   : > { %3188 = vmatmul.mubr.bf16.vlgmr.msra.gmra.mxu1 %v3635_v17  ;;  %3147 = vmatprep.mubr.msk.bf16.mxu0 %vm3505_vm0, %v3504_v1 }
  0x9e   : > { %3191 = vmatprep.mubr.msk.bf16.mxu1 %vm3505_vm0, %v3504_v1  ;;  %3216 = vmatpush3.bf16.msra.mxu0 %v3471_v56 }
  0x9f   : > { %3217 = vmatprep.subr.bf16.mxu0 %v3504_v1  ;;  %3260 = vmatpush3.bf16.msra.mxu1 %v3474_v57 }
  0xa0   : > { %3261 = vmatprep.subr.bf16.mxu1 %v3504_v1 }
  0xa2   : > { %3218 = vmatpush3.bf16.msra.mxu0 %v3472_v58  ;;  %v432_v58 = vld [vmem:[#allocation2 + $0x33] sm:$0xff] }
  0xa3   : > { %3219 = vmatprep.subr.bf16.mxu0 %v3504_v1  ;;  %3262 = vmatpush3.bf16.msra.mxu1 %v3476_v59 }
  0xa4   : > { %3148 = vmatmul.mubr.bf16.gmra.mxu0 %v3659_v22  ;;  %3263 = vmatprep.subr.bf16.mxu1 %v3504_v1 }
  0xa5   : > { %3192 = vmatmul.mubr.bf16.gmra.mxu1 %v3659_v22  ;;  %3151 = vmatprep.mubr.msk.bf16.mxu0 %vm3505_vm0, %v3504_v1 }
  0xa6   : > { %3195 = vmatprep.mubr.msk.bf16.mxu1 %vm3505_vm0, %v3504_v1  ;;  %3220 = vmatpush3.bf16.msra.mxu0 %v3473_v60 }
  0xa7   : > { %3221 = vmatprep.subr.bf16.mxu0 %v3504_v1  ;;  %3264 = vmatpush3.bf16.msra.mxu1 %v3478_v61 }
  0xa8   : > { %3265 = vmatprep.subr.bf16.mxu1 %v3504_v1 }
  0xaa   : > { %3222 = vmatpush3.bf16.msra.mxu0 %v3475_v62 }
  0xab   : > { %3223 = vmatprep.subr.bf16.mxu0 %v3504_v1  ;;  %3266 = vmatpush3.bf16.msra.mxu1 %v3480_v63 }
  0xac   : > { %3152 = vmatmul.mubr.bf16.gmra.mxu0 %v3684_v27  ;;  %3267 = vmatprep.subr.bf16.mxu1 %v3504_v1 }
  0xad   : > { %3196 = vmatmul.mubr.bf16.gmra.mxu1 %v3684_v27  ;;  %3155 = vmatprep.mubr.msk.bf16.mxu0 %vm3505_vm0, %v3504_v1 }
  0xae   : > { %3199 = vmatprep.mubr.msk.bf16.mxu1 %vm3505_vm0, %v3504_v1  ;;  %3224 = vmatpush3.bf16.msra.mxu0 %v3477_v0 }
  0xaf   : > { %3225 = vmatprep.subr.bf16.mxu0 %v3504_v1  ;;  %3268 = vmatpush3.bf16.msra.mxu1 %v3482_v2 }
  0xb0   : > { %3269 = vmatprep.subr.bf16.mxu1 %v3504_v1 }
  0xb2   : > { %3226 = vmatpush3.bf16.msra.mxu0 %v3479_v3  ;;  %v433_v3 = vld [vmem:[#allocation2 + $0x3b] sm:$0xff] }
  0xb3   : > { %3227 = vmatprep.subr.bf16.mxu0 %v3504_v1  ;;  %3270 = vmatpush3.bf16.msra.mxu1 %v3484_v4 }
  0xb4   : > { %3156 = vmatmul.mubr.bf16.gmra.mxu0 %v3709_v32  ;;  %3271 = vmatprep.subr.bf16.mxu1 %v3504_v1 }
  0xb5   : > { %3200 = vmatmul.mubr.bf16.gmra.mxu1 %v3709_v32  ;;  %3159 = vmatprep.mubr.msk.bf16.mxu0 %vm3505_vm0, %v3504_v1 }
  0xb6   : > { %3203 = vmatprep.mubr.msk.bf16.mxu1 %vm3505_vm0, %v3504_v1  ;;  %3228 = vmatpush3.bf16.msra.mxu0 %v3481_v5 }
  0xb7   : > { %3229 = vmatprep.subr.bf16.mxu0 %v3504_v1  ;;  %3272 = vmatpush3.bf16.msra.mxu1 %v3485_v6 }
  0xb8   : > { %3273 = vmatprep.subr.bf16.mxu1 %v3504_v1 }
  0xba   : > { %3230 = vmatpush3.bf16.msra.mxu0 %v3483_v7 }
  0xbb   : > { %3274 = vmatpush3.bf16.msra.mxu1 %v3486_v8  ;;  %3303 = vmatprep.subr.bf16.mxu0 %v3504_v1 }
  0xbc   : > { %3160 = vmatmul.mubr.bf16.gmra.mxu0 %v3734_v37  ;;  %3347 = vmatprep.subr.mxu1 %v3504_v1 }
  0xbd   : > { %3204 = vmatmul.mubr.bf16.gmra.mxu1 %v3734_v37  ;;  %3163 = vmatprep.mubr.msk.bf16.mxu0 %vm3505_vm0, %v3504_v1 }
  0xbe   : > { %3207 = vmatprep.mubr.msk.bf16.mxu1 %vm3505_vm0, %v3504_v1 }
  0xc4   : > { %3164 = vmatmul.mubr.bf16.gmra.mxu0 %v3746_v38 }
  0xc5   : > { %3208 = vmatmul.mubr.bf16.gmra.mxu1 %v3746_v38  ;;  %3167 = vmatprep.mubr.msk.bf16.mxu0 %vm3505_vm0, %v3504_v1 }
  0xc6   : > { %3211 = vmatprep.mubr.msk.bf16.mxu1 %vm3505_vm0, %v3504_v1 }
  0xcc   : > { %3168 = vmatmul.mubr.bf16.gmra.mxu0 %v3755_v39 }
  0xcd   : > { %3212 = vmatmul.mubr.bf16.gmra.mxu1 %v3755_v39  ;;  %3231 = vmatprep.mubr.msk.bf16.mxu0 %vm3505_vm0, %v3504_v1 }
  0xce   : > { %3275 = vmatprep.mubr.msk.bf16.mxu1 %vm3505_vm0, %v3504_v1 }
  0xd4   : > { %3232 = vmatmul.mubr.bf16.vlgmr.msra.gmra.mxu0 %v3635_v17 }
  0xd5   : > { %3235 = vmatprep.mubr.msk.bf16.mxu0 %vm3505_vm0, %v3504_v1  ;;  %3276 = vmatmul.mubr.bf16.vlgmr.msra.gmra.mxu1 %v3635_v17 }
  0xd6   : > { %3279 = vmatprep.mubr.msk.bf16.mxu1 %vm3505_vm0, %v3504_v1  ;;  %3304 = vmatpush3.bf16.msra.mxu0 %v3487_v9 }
  0xd7   : > { %3305 = vmatprep.subr.bf16.mxu0 %v3504_v1 }
  0xda   : > { %3306 = vmatpush3.bf16.msra.mxu0 %v3488_v10 }
  0xdb   : > { %3307 = vmatprep.subr.bf16.mxu0 %v3504_v1 }
  0xdc   : > { %3236 = vmatmul.mubr.bf16.gmra.mxu0 %v3659_v22 }
  0xdd   : > { %3239 = vmatprep.mubr.msk.bf16.mxu0 %vm3505_vm0, %v3504_v1  ;;  %3280 = vmatmul.mubr.bf16.gmra.mxu1 %v3659_v22 }
  0xde   : > { %3283 = vmatprep.mubr.msk.bf16.mxu1 %vm3505_vm0, %v3504_v1  ;;  %3308 = vmatpush3.bf16.msra.mxu0 %v3489_v11  ;;  %v434_v11 = vld [vmem:[#allocation2 + $0x43] sm:$0xff] }
  0xdf   : > { %3309 = vmatprep.subr.bf16.mxu0 %v3504_v1 }
  0xe2   : > { %3310 = vmatpush3.bf16.msra.mxu0 %v3490_v12 }
  0xe3   : > { %3311 = vmatprep.subr.bf16.mxu0 %v3504_v1 }
  0xe4   : > { %3240 = vmatmul.mubr.bf16.gmra.mxu0 %v3684_v27 }
  0xe5   : > { %3243 = vmatprep.mubr.msk.bf16.mxu0 %vm3505_vm0, %v3504_v1  ;;  %3284 = vmatmul.mubr.bf16.gmra.mxu1 %v3684_v27 }
  0xe6   : > { %3287 = vmatprep.mubr.msk.bf16.mxu1 %vm3505_vm0, %v3504_v1  ;;  %3312 = vmatpush3.bf16.msra.mxu0 %v3491_v13 }
  0xe7   : > { %3313 = vmatprep.subr.bf16.mxu0 %v3504_v1 }
  0xea   : > { %3314 = vmatpush3.bf16.msra.mxu0 %v3492_v14 }
  0xeb   : > { %3315 = vmatprep.subr.bf16.mxu0 %v3504_v1 }
  0xec   : > { %v374_v18 = vpop.f32.mrf.mxu0  ;;  %3244 = vmatmul.mubr.bf16.gmra.mxu0 %v3709_v32 }
  0xed   : > { %v439_v19 = vadd.f32 %v427_v15, %v374_v18  ;;  %v562_v20 = vpop.f32.mrf.mxu1  ;;  %3247 = vmatprep.mubr.msk.bf16.mxu0 %vm3505_vm0, %v3504_v1  ;;  %3288 = vmatmul.mubr.bf16.gmra.mxu1 %v3709_v32 }
  0xee   : > { %v2969_v21 = vpop.f32.mrf.mxu0  ;;  %3291 = vmatprep.mubr.msk.bf16.mxu1 %vm3505_vm0, %v3504_v1  ;;  %3316 = vmatpush3.bf16.msra.mxu0 %v3493_v16 }
  0xef   : > { %451 = vst [vmem:[#allocation2 + $0xb] sm:$0xff] %v439_v19  ;;  %v3013_v25 = vpop.f32.mrf.mxu1  ;;  %3317 = vmatprep.subr.bf16.mxu0 %v3504_v1 }
  0xf0   : > { %v377_v26 = vpop.f32.mrf.mxu0 }
  0xf1   : > { %v440_v28 = vadd.f32 %v428_v23, %v377_v26  ;;  %v565_v29 = vpop.f32.mrf.mxu1 }
  0xf2   : > { %v2970_v30 = vpop.f32.mrf.mxu0  ;;  %3318 = vmatpush3.bf16.msra.mxu0 %v3494_v24 }
  0xf3   : > { %452 = vst [vmem:[#allocation2 + $0x13] sm:$0xff] %v440_v28  ;;  %v3014_v33 = vpop.f32.mrf.mxu1  ;;  %v436_v30 = vld [vmem:[#allocation2 + $0x53] sm:$0xff] }
  0xf4   : > { %v382_v34 = vpop.f32.mrf.mxu0  ;;  %3248 = vmatmul.mubr.bf16.gmra.mxu0 %v3734_v37 }
  0xf5   : > { %v441_v35 = vadd.f32 %v429_v31, %v382_v34  ;;  %v570_v36 = vpop.f32.mrf.mxu1  ;;  %3251 = vmatprep.mubr.msk.bf16.mxu0 %vm3505_vm0, %v4031_v40  ;;  %3292 = vmatmul.mubr.bf16.gmra.mxu1 %v3734_v37 }
  0xf6   : > { %v615_v1 = vld [vmem:[#allocation2 + $0xa] sm:$0xff]  ;;  %v2973_v41 = vpop.f32.mrf.mxu0  ;;  %3295 = vmatprep.mubr.msk.bf16.mxu1 %vm3505_vm0, %v4031_v40 }
  0xf7   : > { %v627_v43 = vadd.f32 %v615_v1, %v562_v20  ;;  %453 = vst [vmem:[#allocation2 + $0x1b] sm:$0xff] %v441_v35  ;;  %v3017_v44 = vpop.f32.mrf.mxu1  ;;  %v435_v20 = vld [vmem:[#allocation2 + $0x4b] sm:$0xff] }
  0xf8   : > { %v385_v45 = vpop.f32.mrf.mxu0 }
  0xf9   : > { %639 = vst [vmem:[#allocation2 + $0xa] sm:$0xff] %v627_v43  ;;  %v442_v46 = vadd.f32 %v430_v42, %v385_v45  ;;  %v573_v47 = vpop.f32.mrf.mxu1  ;;  %v437_v42 = vld [vmem:[#allocation2 + $0x5b] sm:$0xff] }
  0xfa   : > { %v616_v48 = vld [vmem:[#allocation2 + $0x12] sm:$0xff]  ;;  %v2974_v49 = vpop.f32.mrf.mxu0 }
  0xfb   : > { %v628_v51 = vadd.f32 %v616_v48, %v565_v29  ;;  %454 = vst [vmem:[#allocation2 + $0x23] sm:$0xff] %v442_v46  ;;  %v3018_v52 = vpop.f32.mrf.mxu1  ;;  %v438_v49 = vld [vmem:[#allocation2 + $0x63] sm:$0x1] }
  0xfc   : > { %v390_v53 = vpop.f32.mrf.mxu0  ;;  %3252 = vmatmul.mubr.bf16.gmra.mxu0 %v3746_v38 }
  0xfd   : > { %640 = vst [vmem:[#allocation2 + $0x12] sm:$0xff] %v628_v51  ;;  %v443_v54 = vadd.f32 %v431_v50, %v390_v53  ;;  %v578_v55 = vpop.f32.mrf.mxu1  ;;  %3255 = vmatprep.mubr.msk.bf16.mxu0 %vm3505_vm0, %v4031_v40  ;;  %3296 = vmatmul.mubr.bf16.gmra.mxu1 %v3746_v38 }
  0xfe   : > { %v617_v56 = vld [vmem:[#allocation2 + $0x1a] sm:$0xff]  ;;  %v2977_v57 = vpop.f32.mrf.mxu0  ;;  %3299 = vmatprep.mubr.msk.bf16.mxu1 %vm3505_vm0, %v4031_v40 }
  0xff   : > { %v629_v59 = vadd.f32 %v617_v56, %v570_v36  ;;  %455 = vst [vmem:[#allocation2 + $0x2b] sm:$0xff] %v443_v54  ;;  %v3021_v60 = vpop.f32.mrf.mxu1 }
 0x100   : > { %v393_v61 = vpop.f32.mrf.mxu0 }
 0x101   : > { %641 = vst [vmem:[#allocation2 + $0x1a] sm:$0xff] %v629_v59  ;;  %v444_v62 = vadd.f32 %v432_v58, %v393_v61  ;;  %v581_v63 = vpop.f32.mrf.mxu1 }
 0x102   : > { %v618_v0 = vld [vmem:[#allocation2 + $0x22] sm:$0xff]  ;;  %v2978_v2 = vpop.f32.mrf.mxu0 }
 0x103   : > { %v630_v4 = vadd.f32 %v618_v0, %v573_v47  ;;  %456 = vst [vmem:[#allocation2 + $0x33] sm:$0xff] %v444_v62  ;;  %v3022_v5 = vpop.f32.mrf.mxu1 }
 0x104   : > { %v398_v6 = vpop.f32.mrf.mxu0  ;;  %3256 = vmatmul.mubr.bf16.gmra.mxu0 %v3755_v39 }
 0x105   : > { %642 = vst [vmem:[#allocation2 + $0x22] sm:$0xff] %v630_v4  ;;  %v445_v7 = vadd.f32 %v433_v3, %v398_v6  ;;  %v586_v8 = vpop.f32.mrf.mxu1  ;;  %3319 = vmatprep.mubr.msk.bf16.mxu0 %vm3505_vm0, %v4031_v40  ;;  %3300 = vmatmul.mubr.bf16.gmra.mxu1 %v3755_v39 }
 0x106   : > { %v619_v9 = vld [vmem:[#allocation2 + $0x2a] sm:$0xff]  ;;  %v2981_v10 = vpop.f32.mrf.mxu0  ;;  %3373 = vmatprep.mubr.msk.f32.mxu1 %vm3505_vm0, %v4031_v40 }
 0x107   : > { %v631_v12 = vadd.f32 %v619_v9, %v578_v55  ;;  %457 = vst [vmem:[#allocation2 + $0x3b] sm:$0xff] %v445_v7  ;;  %v3025_v13 = vpop.f32.mrf.mxu1  ;;  %v992_v7 = vld [vmem:[#allocation2 + $0x1] sm:$0xff] }
 0x108   : > { %v401_v14 = vpop.f32.mrf.mxu0 }
 0x109   : > { %643 = vst [vmem:[#allocation2 + $0x2a] sm:$0xff] %v631_v12  ;;  %v446_v15 = vadd.f32 %v434_v11, %v401_v14  ;;  %v589_v16 = vpop.f32.mrf.mxu1  ;;  %v803_v11 = vld [vmem:[#allocation2 + $0x9] sm:$0xff] }
 0x10a   : > { %v620_v18 = vld [vmem:[#allocation2 + $0x32] sm:$0xff]  ;;  %v2982_v19 = vpop.f32.mrf.mxu0 }
 0x10b   : > { %v632_v21 = vadd.f32 %v620_v18, %v581_v63  ;;  %458 = vst [vmem:[#allocation2 + $0x43] sm:$0xff] %v446_v15  ;;  %v3026_v23 = vpop.f32.mrf.mxu1  ;;  %v804_v19 = vld [vmem:[#allocation2 + $0x11] sm:$0xff] }
 0x10c   : > { %v406_v24 = vpop.f32.mrf.mxu0  ;;  %3320 = vmatmul.mubr.bf16.vlgmr.msra.gmra.mxu0 %v3635_v17 }
 0x10d   : > { %644 = vst [vmem:[#allocation2 + $0x32] sm:$0xff] %v632_v21  ;;  %v447_v25 = vadd.f32 %v435_v20, %v406_v24  ;;  %v594_v26 = vpop.f32.mrf.mxu1  ;;  %3323 = vmatprep.mubr.msk.bf16.mxu0 %vm3505_vm0, %v4031_v40 }
 0x10e   : > { %v621_v28 = vld [vmem:[#allocation2 + $0x3a] sm:$0xff]  ;;  %v2985_v29 = vpop.f32.mrf.mxu0 }
 0x10f   : > { %v633_v31 = vadd.f32 %v621_v28, %v586_v8  ;;  %459 = vst [vmem:[#allocation2 + $0x4b] sm:$0xff] %v447_v25  ;;  %v3029_v33 = vpop.f32.mrf.mxu1 }
 0x110   : > { %v409_v34 = vpop.f32.mrf.mxu0 }
 0x111   : > { %645 = vst [vmem:[#allocation2 + $0x3a] sm:$0xff] %v633_v31  ;;  %v448_v35 = vadd.f32 %v436_v30, %v409_v34  ;;  %v597_v36 = vpop.f32.mrf.mxu1 }
 0x112   : > { %v622_v1 = vld [vmem:[#allocation2 + $0x42] sm:$0xff]  ;;  %v2986_v41 = vpop.f32.mrf.mxu0 }
 0x113   : > { %v634_v17 = vadd.f32 %v622_v1, %v589_v16  ;;  %460 = vst [vmem:[#allocation2 + $0x53] sm:$0xff] %v448_v35  ;;  %v3030_v43 = vpop.f32.mrf.mxu1  ;;  %v806_v35 = vld [vmem:[#allocation2 + $0x21] sm:$0xff] }
 0x114   : > { %v414_v44 = vpop.f32.mrf.mxu0  ;;  %3324 = vmatmul.mubr.bf16.gmra.mxu0 %v3659_v22  ;;  %v807_v43 = vld [vmem:[#allocation2 + $0x29] sm:$0xff] }
 0x115   : > { %646 = vst [vmem:[#allocation2 + $0x42] sm:$0xff] %v634_v17  ;;  %v449_v45 = vadd.f32 %v437_v42, %v414_v44  ;;  %v602_v46 = vpop.f32.mrf.mxu1  ;;  %3327 = vmatprep.mubr.msk.bf16.mxu0 %vm3505_vm0, %v4031_v40 }
 0x116   : > { %v623_v47 = vld [vmem:[#allocation2 + $0x4a] sm:$0xff]  ;;  %v2989_v48 = vpop.f32.mrf.mxu0 }
 0x117   : > { %v635_v50 = vadd.f32 %v623_v47, %v594_v26  ;;  %461 = vst [vmem:[#allocation2 + $0x5b] sm:$0xff] %v449_v45  ;;  %v3033_v51 = vpop.f32.mrf.mxu1  ;;  %v805_v26 = vld [vmem:[#allocation2 + $0x19] sm:$0xff] }
 0x118   : > { %v417_v52 = vpop.f32.mrf.mxu0 }
 0x119   : > { %647 = vst [vmem:[#allocation2 + $0x4a] sm:$0xff] %v635_v50  ;;  %v450_v53 = vadd.f32 %v438_v49, %v417_v52  ;;  %v605_v54 = vpop.f32.mrf.mxu1  ;;  %v808_v50 = vld [vmem:[#allocation2 + $0x31] sm:$0xff] }
 0x11a   : > { %v624_v55 = vld [vmem:[#allocation2 + $0x52] sm:$0xff]  ;;  %v2990_v56 = vpop.f32.mrf.mxu0 }
 0x11b   : > { %v636_v57 = vadd.f32 %v624_v55, %v597_v36  ;;  %462 = vst [vmem:[#allocation2 + $0x63] sm:$0x1] %v450_v53  ;;  %v3034_v22 = vpop.f32.mrf.mxu1  ;;  %v809_v56 = vld [vmem:[#allocation2 + $0x39] sm:$0xff] }
 0x11c   : > { %v422_v58 = vpop.f32.mrf.mxu0  ;;  %3328 = vmatmul.mubr.bf16.gmra.mxu0 %v3684_v27 }
 0x11d   : > { %648 = vst [vmem:[#allocation2 + $0x52] sm:$0xff] %v636_v57  ;;  %v610_v59 = vpop.f32.mrf.mxu1  ;;  %3331 = vmatprep.mubr.msk.bf16.mxu0 %vm3505_vm0, %v4031_v40 }
 0x11e   : > { %v625_v60 = vld [vmem:[#allocation2 + $0x5a] sm:$0xff]  ;;  %v2993_v61 = vpop.f32.mrf.mxu0 }
 0x11f   : > { %v637_v62 = vadd.f32 %v625_v60, %v602_v46  ;;  %v3037_v63 = vpop.f32.mrf.mxu1 }
 0x120   : > { %v424_v0 = vpop.f32.mrf.mxu0 }
 0x121   : > { %649 = vst [vmem:[#allocation2 + $0x5a] sm:$0xff] %v637_v62  ;;  %v612_v2 = vpop.f32.mrf.mxu1  ;;  %v810_v62 = vld [vmem:[#allocation2 + $0x41] sm:$0xff] }
 0x122   : > { %v626_v3 = vld [vmem:[#allocation2 + $0x62] sm:$0x3]  ;;  %v2994_v4 = vpop.f32.mrf.mxu0 }
 0x123   : > { %v638_v5 = vadd.f32 %v626_v3, %v605_v54  ;;  %v3038_v6 = vpop.f32.mrf.mxu1 }
 0x124   : > { %v750_v8 = vpop.f32.mrf.mxu0  ;;  %3332 = vmatmul.mubr.bf16.gmra.mxu0 %v3709_v32 }
 0x125   : > { %650 = vst [vmem:[#allocation2 + $0x62] sm:$0x3] %v638_v5  ;;  %v938_v27 = vpop.f32.mrf.mxu1  ;;  %3335 = vmatprep.mubr.msk.bf16.mxu0 %vm3505_vm0, %v4031_v40  ;;  %v815_v13 = vadd.f32 %v803_v11, %v750_v8  ;;  %v812_v11 = vld [vmem:[#allocation2 + $0x51] sm:$0xff] }
 0x126   : > { %v3057_v9 = vpop.f32.mrf.mxu0  ;;  %v1005_v10 = vadd.f32 %v992_v7, %v938_v27 }
 0x127   : > { %v3101_v12 = vpop.f32.mrf.mxu1 }
 0x128   : > { %1018 = vst [vmem:[#allocation2 + $0x1] sm:$0xff] %v1005_v10  ;;  %v753_v14 = vpop.f32.mrf.mxu0 }
 0x129   : > { %v941_v15 = vpop.f32.mrf.mxu1  ;;  %v816_v21 = vadd.f32 %v804_v19, %v753_v14  ;;  %v813_v19 = vld [vmem:[#allocation2 + $0x59] sm:$0xff] }
 0x12a   : > { %v3058_v16 = vpop.f32.mrf.mxu0  ;;  %v1006_v18 = vadd.f32 %v941_v15, %v815_v13 }
 0x12b   : > { %v3102_v20 = vpop.f32.mrf.mxu1 }
 0x12c   : > { %1019 = vst [vmem:[#allocation2 + $0x9] sm:$0xff] %v1006_v18  ;;  %v758_v32 = vpop.f32.mrf.mxu0  ;;  %3336 = vmatmul.mubr.bf16.gmra.mxu0 %v3734_v37 }
 0x12d   : > { %v946_v23 = vpop.f32.mrf.mxu1  ;;  %3339 = vmatprep.mubr.msk.bf16.mxu0 %vm3505_vm0, %v4031_v40  ;;  %v817_v29 = vadd.f32 %v805_v26, %v758_v32 }
 0x12e   : > { %v3061_v24 = vpop.f32.mrf.mxu0  ;;  %v1007_v25 = vadd.f32 %v946_v23, %v816_v21  ;;  %v814_v23 = vld [vmem:[#allocation2 + $0x61] sm:$0x7] }
 0x12f   : > { %v3105_v28 = vpop.f32.mrf.mxu1 }
 0x130   : > { %1020 = vst [vmem:[#allocation2 + $0x11] sm:$0xff] %v1007_v25  ;;  %v761_v30 = vpop.f32.mrf.mxu0 }
 0x131   : > { %v949_v31 = vpop.f32.mrf.mxu1  ;;  %v818_v1 = vadd.f32 %v806_v35, %v761_v30 }
 0x132   : > { %v3062_v33 = vpop.f32.mrf.mxu0  ;;  %v1008_v34 = vadd.f32 %v949_v31, %v817_v29 }
 0x133   : > { %v3106_v36 = vpop.f32.mrf.mxu1 }
 0x134   : > { %1021 = vst [vmem:[#allocation2 + $0x19] sm:$0xff] %v1008_v34  ;;  %v766_v41 = vpop.f32.mrf.mxu0  ;;  %3340 = vmatmul.mubr.bf16.gmra.mxu0 %v3746_v38 }
 0x135   : > { %v954_v37 = vpop.f32.mrf.mxu1  ;;  %3343 = vmatprep.mubr.msk.bf16.mxu0 %vm3505_vm0, %v4031_v40  ;;  %v819_v45 = vadd.f32 %v807_v43, %v766_v41 }
 0x136   : > { %v3065_v42 = vpop.f32.mrf.mxu0  ;;  %v1009_v17 = vadd.f32 %v954_v37, %v818_v1 }
 0x137   : > { %v3109_v44 = vpop.f32.mrf.mxu1 }
 0x138   : > { %1022 = vst [vmem:[#allocation2 + $0x21] sm:$0xff] %v1009_v17  ;;  %v769_v46 = vpop.f32.mrf.mxu0 }
 0x139   : > { %v957_v47 = vpop.f32.mrf.mxu1  ;;  %v820_v52 = vadd.f32 %v808_v50, %v769_v46  ;;  %v1184_v46 = vld [vmem:[#allocation2] sm:$0xff] }
 0x13a   : > { %v3066_v48 = vpop.f32.mrf.mxu0  ;;  %v1010_v49 = vadd.f32 %v957_v47, %v819_v45 }
 0x13b   : > { %v3110_v51 = vpop.f32.mrf.mxu1 }
 0x13c   : > { %1023 = vst [vmem:[#allocation2 + $0x29] sm:$0xff] %v1010_v49  ;;  %v774_v53 = vpop.f32.mrf.mxu0  ;;  %3344 = vmatmul.mubr.bf16.gmra.mxu0 %v3755_v39  ;;  %v811_v39 = vld [vmem:[#allocation2 + $0x49] sm:$0xff] }
 0x13d   : > { %v962_v38 = vpop.f32.mrf.mxu1  ;;  %v821_v22 = vadd.f32 %v809_v56, %v774_v53 }
 0x13e   : > { %v3069_v54 = vpop.f32.mrf.mxu0  ;;  %v1011_v55 = vadd.f32 %v962_v38, %v820_v52 }
 0x13f   : > { %v3113_v57 = vpop.f32.mrf.mxu1 }
 0x140   : > { %1024 = vst [vmem:[#allocation2 + $0x31] sm:$0xff] %v1011_v55  ;;  %v777_v58 = vpop.f32.mrf.mxu0  ;;  %v1185_v57 = vld [vmem:[#allocation2 + $0x8] sm:$0xff] }
 0x141   : > { %v965_v59 = vpop.f32.mrf.mxu1  ;;  %v822_v0 = vadd.f32 %v810_v62, %v777_v58 }
 0x142   : > { %v3070_v60 = vpop.f32.mrf.mxu0  ;;  %v1012_v61 = vadd.f32 %v965_v59, %v821_v22 }
 0x143   : > { %v3114_v63 = vpop.f32.mrf.mxu1 }
 0x144   : > { %1025 = vst [vmem:[#allocation2 + $0x39] sm:$0xff] %v1012_v61  ;;  %v782_v2 = vpop.f32.mrf.mxu0 }
 0x145   : > { %v970_v3 = vpop.f32.mrf.mxu1  ;;  %v823_v7 = vadd.f32 %v811_v39, %v782_v2  ;;  %v1186_v2 = vld [vmem:[#allocation2 + $0x10] sm:$0xff] }
 0x146   : > { %v3073_v4 = vpop.f32.mrf.mxu0  ;;  %v1013_v5 = vadd.f32 %v970_v3, %v822_v0 }
 0x147   : > { %v3117_v6 = vpop.f32.mrf.mxu1 }
 0x148   : > { %1026 = vst [vmem:[#allocation2 + $0x41] sm:$0xff] %v1013_v5  ;;  %v785_v8 = vpop.f32.mrf.mxu0 }
 0x149   : > { %v973_v27 = vpop.f32.mrf.mxu1  ;;  %v824_v13 = vadd.f32 %v812_v11, %v785_v8 }
 0x14a   : > { %v3074_v9 = vpop.f32.mrf.mxu0  ;;  %v1014_v10 = vadd.f32 %v973_v27, %v823_v7 }
 0x14b   : > { %v3118_v12 = vpop.f32.mrf.mxu1  ;;  %v1187_v9 = vld [vmem:[#allocation2 + $0x18] sm:$0xff] }
 0x14c   : > { %1027 = vst [vmem:[#allocation2 + $0x49] sm:$0xff] %v1014_v10  ;;  %v790_v14 = vpop.f32.mrf.mxu0 }
 0x14d   : > { %v978_v15 = vpop.f32.mrf.mxu1  ;;  %v825_v21 = vadd.f32 %v813_v19, %v790_v14  ;;  %v1188_v19 = vld [vmem:[#allocation2 + $0x20] sm:$0xff] }
 0x14e   : > { %v3077_v16 = vpop.f32.mrf.mxu0  ;;  %v1015_v18 = vadd.f32 %v978_v15, %v824_v13 }
 0x14f   : > { %v3121_v20 = vpop.f32.mrf.mxu1 }
 0x150   : > { %1028 = vst [vmem:[#allocation2 + $0x51] sm:$0xff] %v1015_v18  ;;  %v793_v32 = vpop.f32.mrf.mxu0 }
 0x151   : > { %v826_v24 = vadd.f32 %v814_v23, %v793_v32  ;;  %v981_v25 = vpop.f32.mrf.mxu1 }
 0x152   : > { %v3078_v26 = vpop.f32.mrf.mxu0  ;;  %v1016_v28 = vadd.f32 %v981_v25, %v825_v21 }
 0x153   : > { %838 = vst [vmem:[#allocation2 + $0x61] sm:$0x7] %v826_v24  ;;  %v3122_v29 = vpop.f32.mrf.mxu1 }
 0x154   : > { %1029 = vst [vmem:[#allocation2 + $0x59] sm:$0xff] %v1016_v28  ;;  %v798_v30 = vpop.f32.mrf.mxu0  ;;  %v1189_v29 = vld [vmem:[#allocation2 + $0x28] sm:$0xff] }
 0x155   : > { %v986_v31 = vpop.f32.mrf.mxu1 }
 0x156   : > { %v3081_v33 = vpop.f32.mrf.mxu0 }
 0x157   : > { %v3125_v34 = vpop.f32.mrf.mxu1 }
 0x158   : > { %v800_v35 = vpop.f32.mrf.mxu0 }
 0x159   : > { %v989_v36 = vpop.f32.mrf.mxu1 }
 0x15a   : > { %v1004_v1 = vld [vmem:[#allocation2 + $0x61] sm:$0x7]  ;;  %v3082_v41 = vpop.f32.mrf.mxu0 }
 0x15b   : > { %v1017_v37 = vadd.f32 %v1004_v1, %v986_v31  ;;  %v3126_v42 = vpop.f32.mrf.mxu1 }
 0x15c   : > { %v1130_v17 = vpop.f32.mrf.mxu0 }
 0x15d   : > { %1030 = vst [vmem:[#allocation2 + $0x61] sm:$0x7] %v1017_v37  ;;  %v1322_v43 = vpop.f32.mrf.mxu1  ;;  %v1197_v52 = vadd.f32 %v1184_v46, %v1130_v17  ;;  %v1190_v37 = vld [vmem:[#allocation2 + $0x30] sm:$0xff] }
 0x15e   : > { %v3145_v44 = vpop.f32.mrf.mxu0  ;;  %v1403_v47 = vrot.slane %v1322_v43, 1 }
 0x15f   : > { %v3189_v45 = vpop.f32.mrf.mxu1 }
 0x160   : > { %v1133_v48 = vpop.f32.mrf.mxu0 }
 0x161   : > { %v1325_v49 = vpop.f32.mrf.mxu1  ;;  %v1198_v59 = vadd.f32 %v1185_v57, %v1133_v48 }
 0x162   : > { %v3146_v50 = vpop.f32.mrf.mxu0  ;;  %v1404_v51 = vrot.slane %v1325_v49, 1  ;;  %v1191_v49 = vld [vmem:[#allocation2 + $0x38] sm:$0xff] }
 0x163   : > { %v3190_v53 = vpop.f32.mrf.mxu1 }
 0x164   : > { %v1405_v38 = vsel %vm1402_vm1, %v1403_v47, %v1404_v51  ;;  %v1138_v54 = vpop.f32.mrf.mxu0 }
 0x165   : > { %v4070_v55 = vadd.f32 %v1405_v38, %v1197_v52  ;;  %v1330_v56 = vpop.f32.mrf.mxu1  ;;  %v1199_v5 = vadd.f32 %v1186_v2, %v1138_v54 }
 0x166   : > { %v3149_v22 = vpop.f32.mrf.mxu0  ;;  %v1406_v58 = vrot.slane %v1330_v56, 1 }
 0x167   : > { %v3193_v60 = vpop.f32.mrf.mxu1  ;;  %v1192_v22 = vld [vmem:[#allocation2 + $0x40] sm:$0xff] }
 0x168   : > { %v1407_v61 = vsel %vm1402_vm1, %v1404_v51, %v1406_v58  ;;  %v1141_v62 = vpop.f32.mrf.mxu0 }
 0x169   : > { %v4073_v63 = vadd.f32 %v1407_v61, %v1198_v59  ;;  %v1333_v0 = vpop.f32.mrf.mxu1  ;;  %v1200_v12 = vadd.f32 %v1187_v9, %v1141_v62 }
 0x16a   : > { %v3150_v3 = vpop.f32.mrf.mxu0  ;;  %v1408_v4 = vrot.slane %v1333_v0, 1 }
 0x16b   : > { %v3194_v39 = vpop.f32.mrf.mxu1 }
 0x16c   : > { %v1409_v6 = vsel %vm1402_vm1, %v1406_v58, %v1408_v4  ;;  %v1146_v7 = vpop.f32.mrf.mxu0 }
 0x16d   : > { %v4076_v8 = vadd.f32 %v1409_v6, %v1199_v5  ;;  %v1338_v27 = vpop.f32.mrf.mxu1  ;;  %v1201_v32 = vadd.f32 %v1188_v19, %v1146_v7 }
 0x16e   : > { %v3153_v10 = vpop.f32.mrf.mxu0  ;;  %v1410_v11 = vrot.slane %v1338_v27, 1 }
 0x16f   : > { %v3197_v13 = vpop.f32.mrf.mxu1 }
 0x170   : > { %v1411_v14 = vsel %vm1402_vm1, %v1408_v4, %v1410_v11  ;;  %v1149_v15 = vpop.f32.mrf.mxu0  ;;  %v1193_v4 = vld [vmem:[#allocation2 + $0x48] sm:$0xff] }
 0x171   : > { %v4079_v16 = vadd.f32 %v1411_v14, %v1200_v12  ;;  %v1341_v18 = vpop.f32.mrf.mxu1  ;;  %v1202_v33 = vadd.f32 %v1189_v29, %v1149_v15  ;;  %v1194_v12 = vld [vmem:[#allocation2 + $0x50] sm:$0xff] }
 0x172   : > { %v3154_v20 = vpop.f32.mrf.mxu0  ;;  %v1412_v21 = vrot.slane %v1341_v18, 1 }
 0x173   : > { %v3198_v23 = vpop.f32.mrf.mxu1 }
 0x174   : > { %v1413_v24 = vsel %vm1402_vm1, %v1410_v11, %v1412_v21  ;;  %v1154_v25 = vpop.f32.mrf.mxu0 }
 0x175   : > { %v4082_v26 = vadd.f32 %v1413_v24, %v1201_v32  ;;  %v1346_v28 = vpop.f32.mrf.mxu1  ;;  %v1203_v43 = vadd.f32 %v1190_v37, %v1154_v25  ;;  %v1195_v25 = vld [vmem:[#allocation2 + $0x58] sm:$0xff] }
 0x176   : > { %v3157_v30 = vpop.f32.mrf.mxu0  ;;  %v1414_v31 = vrot.slane %v1346_v28, 1 }
 0x177   : > { %v3201_v34 = vpop.f32.mrf.mxu1 }
 0x178   : > { %v1415_v35 = vsel %vm1402_vm1, %v1412_v21, %v1414_v31  ;;  %v1157_v36 = vpop.f32.mrf.mxu0  ;;  %v1196_v21 = vld [vmem:[#allocation2 + $0x60] sm:$0xf] }
 0x179   : > { %v4085_v1 = vadd.f32 %v1415_v35, %v1202_v33  ;;  %v1349_v41 = vpop.f32.mrf.mxu1  ;;  %v1204_v52 = vadd.f32 %v1191_v49, %v1157_v36 }
 0x17a   : > { %v3158_v42 = vpop.f32.mrf.mxu0  ;;  %v1416_v17 = vrot.slane %v1349_v41, 1 }
 0x17b   : > { %v3202_v44 = vpop.f32.mrf.mxu1 }
 0x17c   : > { %v1417_v45 = vsel %vm1402_vm1, %v1414_v31, %v1416_v17  ;;  %v1162_v46 = vpop.f32.mrf.mxu0 }
 0x17d   : > { %v4088_v47 = vadd.f32 %v1417_v45, %v1203_v43  ;;  %v1354_v48 = vpop.f32.mrf.mxu1  ;;  %v1205_v60 = vadd.f32 %v1192_v22, %v1162_v46 }
 0x17e   : > { %v3161_v50 = vpop.f32.mrf.mxu0  ;;  %v1418_v51 = vrot.slane %v1354_v48, 1 }
 0x17f   : > { %v3205_v53 = vpop.f32.mrf.mxu1 }
 0x180   : > { %v1419_v38 = vsel %vm1402_vm1, %v1416_v17, %v1418_v51  ;;  %v1165_v54 = vpop.f32.mrf.mxu0 }
 0x181   : > { %v4091_v56 = vadd.f32 %v1419_v38, %v1204_v52  ;;  %v1357_v57 = vpop.f32.mrf.mxu1  ;;  %v1206_v6 = vadd.f32 %v1193_v4, %v1165_v54 }
 0x182   : > { %v3162_v58 = vpop.f32.mrf.mxu0  ;;  %v1420_v59 = vrot.slane %v1357_v57, 1 }
 0x183   : > { %v3206_v61 = vpop.f32.mrf.mxu1 }
 0x184   : > { %v1421_v62 = vsel %vm1402_vm1, %v1418_v51, %v1420_v59  ;;  %v1170_v0 = vpop.f32.mrf.mxu0 }
 0x185   : > { %v4094_v2 = vadd.f32 %v1421_v62, %v1205_v60  ;;  %v1362_v3 = vpop.f32.mrf.mxu1  ;;  %v1207_v15 = vadd.f32 %v1194_v12, %v1170_v0 }
 0x186   : > { %v3165_v5 = vpop.f32.mrf.mxu0  ;;  %v1422_v39 = vrot.slane %v1362_v3, 1 }
 0x187   : > { %v3209_v7 = vpop.f32.mrf.mxu1 }
 0x188   : > { %v1423_v27 = vsel %vm1402_vm1, %v1420_v59, %v1422_v39  ;;  %v1173_v9 = vpop.f32.mrf.mxu0 }
 0x189   : > { %v4097_v10 = vadd.f32 %v1423_v27, %v1206_v6  ;;  %v1365_v11 = vpop.f32.mrf.mxu1  ;;  %v1208_v30 = vadd.f32 %v1195_v25, %v1173_v9 }
 0x18a   : > { %v3166_v13 = vpop.f32.mrf.mxu0  ;;  %v1424_v14 = vrot.slane %v1365_v11, 1 }
 0x18b   : > { %v3210_v18 = vpop.f32.mrf.mxu1 }
 0x18c   : > { %v1425_v19 = vsel %vm1402_vm1, %v1422_v39, %v1424_v14  ;;  %v1178_v20 = vpop.f32.mrf.mxu0 }
 0x18d   : > { %v4100_v32 = vadd.f32 %v1425_v19, %v1207_v15  ;;  %v1209_v23 = vadd.f32 %v1196_v21, %v1178_v20  ;;  %v1370_v24 = vpop.f32.mrf.mxu1 }
 0x18e   : > { %v3169_v28 = vpop.f32.mrf.mxu0  ;;  %v1426_v29 = vrot.slane %v1370_v24, 1 }
 0x18f   : > { %1222 = vst [vmem:[#allocation2 + $0x60] sm:$0xf] %v1209_v23  ;;  %v3213_v31 = vpop.f32.mrf.mxu1 }
 0x190   : > { %v1427_v33 = vsel %vm1402_vm1, %v1424_v14, %v1426_v29  ;;  %v1181_v34 = vpop.f32.mrf.mxu0 }
 0x191   : > { %v1452_v35 = vadd.f32 %v1427_v33, %v1208_v30  ;;  %v1373_v36 = vpop.f32.mrf.mxu1 }
 0x192   : > { %v3170_v41 = vpop.f32.mrf.mxu0 }
 0x193   : > { %1465 = vst [vmem:[#allocation2 + $0x58] sm:$0xff] %v1452_v35  ;;  %v3214_v37 = vpop.f32.mrf.mxu1 }
 0x194   : > { %v1566_v42 = vpop.f32.mrf.mxu0 }
 0x195   : > { %v1801_v17 = vpop.f32.mrf.mxu1 }
 0x196   : > { %v1388_v43 = vld [vmem:[#allocation2 + $0x60] sm:$0x7]  ;;  %v3233_v44 = vpop.f32.mrf.mxu0 }
 0x197   : > { %v1453_v45 = vadd.f32 %v1426_v29, %v1388_v43  ;;  %v3277_v46 = vpop.f32.mrf.mxu1 }
 0x198   : > { %v4103_v48 = vpop.f32.mrf.mxu0 }
 0x199   : > { %1466 = vst [vmem:[#allocation2 + $0x60] sm:$0x7] %v1453_v45  ;;  %v4105_v49 = vpop.f32.mrf.mxu1 }
 0x19a   : > { %v3234_v50 = vpop.f32.mrf.mxu0  ;;  %v1630_v44 = vld [vmem:[#allocation2 + $0x58] sm:$0x7] }
 0x19b   : > { %v3278_v51 = vpop.f32.mrf.mxu1 }
 0x19c   : > { %v4107_v52 = vpop.f32.mrf.mxu0 }
 0x19d   : > { %v4109_v53 = vpop.f32.mrf.mxu1 }
 0x19e   : > { %v3237_v38 = vpop.f32.mrf.mxu0 }
 0x19f   : > { %v3281_v54 = vpop.f32.mrf.mxu1 }
 0x1a0   : > { %v4111_v57 = vpop.f32.mrf.mxu0  ;;  %v4120_v22 = vld [vmem:[#allocation2 + $0x60] sm:$0xf] }
 0x1a1   : > { %3348 = vmatpush3.msk.msra.mxu1 %vm2192_vm2, %v4120_v22  ;;  %v2752_v58 = vpack.c.bf16 %v4120_v22, %v4120_v22  ;;  %v4126_v59 = vpop.f32.mrf.mxu1 }
 0x1a2   : > { %v3238_v60 = vpop.f32.mrf.mxu0  ;;  %3349 = vmatprep.subr.mxu1 %v4031_v40 }
 0x1a3   : > { %2419 = vst [vmem:[%s4118_s29 + $0x30] sm:$0x3] %v2752_v58  ;;  %v3282_v61 = vpop.f32.mrf.mxu1  ;;  %v1644_v58 = vrot.slane %v4107_v52, 1 }
 0x1a4   : > { %v4130_v62 = vpop.f32.mrf.mxu0 }
 0x1a5   : > { %v4132_v0 = vpop.f32.mrf.mxu1 }
 0x1a6   : > { %v3241_v3 = vpop.f32.mrf.mxu0 }
 0x1a7   : > { %v3285_v4 = vpop.f32.mrf.mxu1  ;;  %v1643_v3 = vrot.slane %v4103_v48, 1  ;;  %v1882_v48 = vrot.slane %v4126_v59, 2 }
 0x1a8   : > { %v4134_v5 = vpop.f32.mrf.mxu0  ;;  %v1879_v4 = vrot.slane %v4105_v49, 2 }
 0x1a9   : > { %v4136_v39 = vpop.f32.mrf.mxu1 }
 0x1aa   : > { %v3242_v6 = vpop.f32.mrf.mxu0 }
 0x1ab   : > { %v3286_v7 = vpop.f32.mrf.mxu1 }
 0x1ac   : > { %v4138_v27 = vpop.f32.mrf.mxu0  ;;  %v1645_v7 = vsel %vm1402_vm1, %v1643_v3, %v1644_v58 }
 0x1ad   : > { %v4140_v9 = vpop.f32.mrf.mxu1 }
 0x1ae   : > { %v3245_v11 = vpop.f32.mrf.mxu0 }
 0x1af   : > { %v3289_v12 = vpop.f32.mrf.mxu1  ;;  %v1646_v11 = vrot.slane %v4111_v57, 1 }
 0x1b0   : > { %v4142_v13 = vpop.f32.mrf.mxu0  ;;  %v1880_v12 = vrot.slane %v4109_v53, 2 }
 0x1b1   : > { %v4144_v14 = vpop.f32.mrf.mxu1 }
 0x1b2   : > { %v3246_v15 = vpop.f32.mrf.mxu0  ;;  %v1881_v57 = vsel %vm1878_vm3, %v1879_v4, %v1880_v12 }
 0x1b3   : > { %v3290_v18 = vpop.f32.mrf.mxu1 }
 0x1b4   : > { %v4146_v19 = vpop.f32.mrf.mxu0 }
 0x1b5   : > { %v4148_v20 = vpop.f32.mrf.mxu1 }
 0x1b6   : > { %v3249_v21 = vpop.f32.mrf.mxu0 }
 0x1b7   : > { %v3293_v23 = vpop.f32.mrf.mxu1 }
 0x1b8   : > { %v4150_v24 = vpop.f32.mrf.mxu0  ;;  %v1678_v23 = vadd.f32 %v1645_v7, %v4070_v55 }
 0x1b9   : > { %v4152_v25 = vpop.f32.mrf.mxu1 }
 0x1ba   : > { %v3250_v28 = vpop.f32.mrf.mxu0 }
 0x1bb   : > { %v3294_v29 = vpop.f32.mrf.mxu1  ;;  %v1647_v28 = vsel %vm1402_vm1, %v1644_v58, %v1646_v11 }
 0x1bc   : > { %v4154_v30 = vpop.f32.mrf.mxu0  ;;  %v1648_v29 = vrot.slane %v4130_v62, 1 }
 0x1bd   : > { %v4156_v31 = vpop.f32.mrf.mxu1 }
 0x1be   : > { %v3253_v33 = vpop.f32.mrf.mxu0  ;;  %v1649_v59 = vsel %vm1402_vm1, %v1646_v11, %v1648_v29 }
 0x1bf   : > { %v3297_v34 = vpop.f32.mrf.mxu1 }
 0x1c0   : > { %v4158_v35 = vpop.f32.mrf.mxu0 }
 0x1c1   : > { %v4160_v36 = vpop.f32.mrf.mxu1 }
 0x1c2   : > { %v3254_v41 = vpop.f32.mrf.mxu0 }
 0x1c3   : > { %v3298_v37 = vpop.f32.mrf.mxu1  ;;  %v1679_v41 = vadd.f32 %v1647_v28, %v4073_v63  ;;  %v1886_v63 = vrot.slane %v4136_v39, 2 }
 0x1c4   : > { %v4162_v42 = vpop.f32.mrf.mxu0  ;;  %v1914_v37 = vadd.f32 %v1881_v57, %v1678_v23  ;;  %v1890_v57 = vrot.slane %v4144_v14, 2 }
 0x1c5   : > { %v1664_v17 = vrot.slane %v4162_v42, 1  ;;  %v4165_v43 = vpop.f32.mrf.mxu1 }
 0x1c6   : > { %v3257_v45 = vpop.f32.mrf.mxu0  ;;  %v1900_v15 = vrot.slane %v4165_v43, 2 }
 0x1c7   : > { %v1689_v46 = vadd.f32 %v1664_v17, %v1630_v44  ;;  %v3301_v50 = vpop.f32.mrf.mxu1  ;;  %v1883_v44 = vsel %vm1878_vm3, %v1880_v12, %v1882_v48  ;;  %v1650_v45 = vrot.slane %v4134_v5, 1  ;;  %v1652_v5 = vrot.slane %v4138_v27, 1 }
 0x1c8   : > { %v1616_v51 = vpop.f32.mrf.mxu0  ;;  %v1915_v58 = vadd.f32 %v1883_v44, %v1679_v41 }
 0x1c9   : > { %1701 = vst [vmem:[#allocation2 + $0x58] sm:$0x7] %v1689_v46  ;;  %v1851_v38 = vpop.f32.mrf.mxu1  ;;  %v1884_v46 = vrot.slane %v4132_v0, 2 }
 0x1ca   : > { %v3258_v54 = vpop.f32.mrf.mxu0 }
 0x1cb   : > { %v3302_v60 = vpop.f32.mrf.mxu1  ;;  %v1680_v54 = vadd.f32 %v1649_v59, %v4076_v8  ;;  %v1885_v0 = vsel %vm1878_vm3, %v1882_v48, %v1884_v46  ;;  %v1887_v39 = vsel %vm1878_vm3, %v1884_v46, %v1886_v63  ;;  %v1658_v46 = vrot.slane %v4150_v24, 1 }
 0x1cc   : > { %v2037_v61 = vpop.f32.mrf.mxu0  ;;  %v1660_v24 = vrot.slane %v4154_v30, 1 }
 0x1cd   : > { %v1651_v61 = vsel %vm1402_vm1, %v1648_v29, %v1650_v45  ;;  %v1916_v11 = vadd.f32 %v1885_v0, %v1680_v54 }
 0x1ce   : > { %v3321_v6 = vpop.f32.mrf.mxu0  ;;  %v1681_v8 = vadd.f32 %v1651_v61, %v4079_v16 }
 0x1d0   : > { %v1865_v18 = vld [vmem:[#allocation2 + $0x58] sm:$0x3]  ;;  %v2039_v21 = vpop.f32.mrf.mxu0  ;;  %v1917_v29 = vadd.f32 %v1887_v39, %v1681_v8  ;;  %v1661_v39 = vsel %vm1402_vm1, %v1658_v46, %v1660_v24 }
 0x1d1   : > { %v1925_v52 = vadd.f32 %v1900_v15, %v1865_v18  ;;  %v2115_v33 = vrot.slane %v2039_v21, 3  ;;  %v1653_v18 = vsel %vm1402_vm1, %v1650_v45, %v1652_v5  ;;  %v1654_v21 = vrot.slane %v4142_v13, 1 }
 0x1d2   : > { %v3322_v49 = vpop.f32.mrf.mxu0  ;;  %v1682_v28 = vadd.f32 %v1653_v18, %v4082_v26  ;;  %v1656_v13 = vrot.slane %v4146_v19, 1 }
 0x1d3   : > { %1937 = vst [vmem:[#allocation2 + $0x58] sm:$0x3] %v1925_v52  ;;  %v1888_v52 = vrot.slane %v4140_v9, 2 }
 0x1d4   : > { %v2044_v53 = vpop.f32.mrf.mxu0  ;;  %v1657_v45 = vsel %vm1402_vm1, %v1654_v21, %v1656_v13 }
 0x1d5   : > { %v2116_v34 = vrot.slane %v2044_v53, 3  ;;  %v1889_v9 = vsel %vm1878_vm3, %v1886_v63, %v1888_v52  ;;  %v1891_v14 = vsel %vm1878_vm3, %v1888_v52, %v1890_v57 }
 0x1d6   : > { %v3325_v55 = vpop.f32.mrf.mxu0 }
 0x1d7   : > { %v2117_v62 = vsel %vm2114_vm4, %v2115_v33, %v2116_v34  ;;  %v1655_v33 = vsel %vm1402_vm1, %v1652_v5, %v1654_v21  ;;  %v1918_v55 = vadd.f32 %v1889_v9, %v1682_v28  ;;  %v1659_v5 = vsel %vm1402_vm1, %v1656_v13, %v1658_v46 }
 0x1d8   : > { %v4189_v50 = vadd.f32 %v2117_v62, %v1914_v37  ;;  %v2047_v51 = vpop.f32.mrf.mxu0  ;;  %v1683_v26 = vadd.f32 %v1655_v33, %v4085_v1  ;;  %v1892_v62 = vrot.slane %v4148_v20, 2 }
 0x1d9   : > { %v2118_v38 = vrot.slane %v2047_v51, 3 }
 0x1da   : > { %2162 = vst [vmem:[#allocation2] sm:$0xff] %v4189_v50  ;;  %v3326_v60 = vpop.f32.mrf.mxu0  ;;  %v1919_v63 = vadd.f32 %v1891_v14, %v1683_v26  ;;  %v1893_v20 = vsel %vm1878_vm3, %v1890_v57, %v1892_v62 }
 0x1db   : > { %v2119_v3 = vsel %vm2114_vm4, %v2116_v34, %v2118_v38  ;;  %v1894_v60 = vrot.slane %v4152_v25, 2 }
 0x1dc   : > { %v4198_v4 = vadd.f32 %v2119_v3, %v1915_v58  ;;  %v2052_v6 = vpop.f32.mrf.mxu0  ;;  %v1684_v58 = vadd.f32 %v1657_v45, %v4088_v47  ;;  %v1685_v47 = vadd.f32 %v1659_v5, %v4091_v56 }
 0x1dd   : > { %v2120_v7 = vrot.slane %v2052_v6, 3  ;;  %v1895_v25 = vsel %vm1878_vm3, %v1892_v62, %v1894_v60 }
 0x1de   : > { %2163 = vst [vmem:[#allocation2 + $0x8] sm:$0xff] %v4198_v4  ;;  %v3329_v12 = vpop.f32.mrf.mxu0  ;;  %v2756_v27 = vpack.c.bf16 %v4198_v4, %v4189_v50  ;;  %v1920_v8 = vadd.f32 %v1893_v20, %v1684_v58  ;;  %v2279_v20 = vmul.f32 %v4120_v22, %v4120_v22 }
 0x1df   : > { %v2121_v23 = vsel %vm2114_vm4, %v2118_v38, %v2120_v7  ;;  %v1662_v12 = vrot.slane %v4158_v35, 1 }
 0x1e0   : > { %v4209_v48 = vadd.f32 %v2121_v23, %v1916_v11  ;;  %v2055_v16 = vpop.f32.mrf.mxu0  ;;  %2757 = vst [vmem:[%s4118_s29] sm:$0xff] %v2756_v27   ;;  %v1896_v27 = vrot.slane %v4156_v31, 2  ;;  %v1686_v23 = vadd.f32 %v1661_v39, %v4094_v2  ;;  %v1898_v31 = vrot.slane %v4160_v36, 2 }
 0x1e1   : > { %v2122_v49 = vrot.slane %v2055_v16, 3  ;;  %v1921_v16 = vadd.f32 %v1895_v25, %v1685_v47  ;;  %v1663_v28 = vsel %vm1402_vm1, %v1660_v24, %v1662_v12  ;;  %v2187_v24 = vld [vmem:[%s4354_s2] sm:$0x1] }
 0x1e2   : > { %2164 = vst [vmem:[#allocation2 + $0x10] sm:$0xff] %v4209_v48  ;;  %v3330_v53 = vpop.f32.mrf.mxu0  ;;  %v1687_v13 = vadd.f32 %v1663_v28, %v4097_v10  ;;  %v1899_v36 = vsel %vm1878_vm3, %v1896_v27, %v1898_v31  ;;  %v1901_v42 = vsel %vm1878_vm3, %v1898_v31, %v1900_v15  ;;  %v2269_v39 = vmul.f32 %v4209_v48, %v4209_v48 }
 0x1e3   : > { %v2123_v34 = vsel %vm2114_vm4, %v2120_v7, %v2122_v49 }
 0x1e4   : > { %v4219_v41 = vadd.f32 %v2123_v34, %v1917_v29  ;;  %v2060_v37 = vpop.f32.mrf.mxu0  ;;  %v1897_v29 = vsel %vm1878_vm3, %v1894_v60, %v1896_v27 }
 0x1e5   : > { %v2124_v44 = vrot.slane %v2060_v37, 3  ;;  %v1922_v2 = vadd.f32 %v1897_v29, %v1686_v23  ;;  %v1665_v37 = vsel %vm1402_vm1, %v1662_v12, %v1664_v17 }
 0x1e6   : > { %2165 = vst [vmem:[#allocation2 + $0x18] sm:$0xff] %v4219_v41  ;;  %v3333_v59 = vpop.f32.mrf.mxu0  ;;  %v2761_v19 = vpack.c.bf16 %v4219_v41, %v4209_v48  ;;  %v1688_v14 = vadd.f32 %v1665_v37, %v4100_v32 }
 0x1e7   : > { %v2125_v51 = vsel %vm2114_vm4, %v2122_v49, %v2124_v44  ;;  %v1923_v59 = vadd.f32 %v1899_v36, %v1687_v13 }
 0x1e8   : > { %v4230_v38 = vadd.f32 %v2125_v51, %v1918_v55  ;;  %v2063_v1 = vpop.f32.mrf.mxu0  ;;  %2783 = vst [vmem:[%s4118_s29 + $0x8] sm:$0xff] %v2761_v19   ;;  %v1924_v51 = vadd.f32 %v1901_v42, %v1688_v14 }
 0x1e9   : > { %v2126_v54 = vrot.slane %v2063_v1, 3  ;;  %v2101_v1 = vld [vmem:[#allocation2 + $0x58] sm:$0x1] }
 0x1ea   : > { %2166 = vst [vmem:[#allocation2 + $0x20] sm:$0xff] %v4230_v38  ;;  %v3334_v61 = vpop.f32.mrf.mxu0 }
 0x1eb   : > { %v2127_v0 = vsel %vm2114_vm4, %v2124_v44, %v2126_v54 }
 0x1ec   : > { %v4240_v3 = vadd.f32 %v2127_v0, %v1919_v63  ;;  %v2068_v6 = vpop.f32.mrf.mxu0 }
 0x1ed   : > { %v2128_v7 = vrot.slane %v2068_v6, 3 }
 0x1ee   : > { %2167 = vst [vmem:[#allocation2 + $0x28] sm:$0xff] %v4240_v3  ;;  %v3337_v11 = vpop.f32.mrf.mxu0  ;;  %v2766_v30 = vpack.c.bf16 %v4240_v3, %v4230_v38  ;;  %v2272_v25 = vmul.f32 %v4240_v3, %v4240_v3 }
 0x1ef   : > { %v2129_v18 = vsel %vm2114_vm4, %v2126_v54, %v2128_v7  ;;  %v2271_v11 = vmul.f32 %v4230_v38, %v4230_v38 }
 0x1f0   : > { %v4251_v21 = vadd.f32 %v2129_v18, %v1920_v8  ;;  %v2071_v56 = vpop.f32.mrf.mxu0  ;;  %2784 = vst [vmem:[%s4118_s29 + $0x10] sm:$0xff] %v2766_v30   ;;  %v2270_v30 = vmul.f32 %v4219_v41, %v4219_v41 }
 0x1f1   : > { %v2130_v52 = vrot.slane %v2071_v56, 3 }
 0x1f2   : > { %2168 = vst [vmem:[#allocation2 + $0x30] sm:$0xff] %v4251_v21  ;;  %v3338_v49 = vpop.f32.mrf.mxu0  ;;  %v2273_v8 = vmul.f32 %v4251_v21, %v4251_v21 }
 0x1f3   : > { %v2131_v35 = vsel %vm2114_vm4, %v2128_v7, %v2130_v52 }
 0x1f4   : > { %v4260_v57 = vadd.f32 %v2131_v35, %v1921_v16  ;;  %v2076_v53 = vpop.f32.mrf.mxu0 }
 0x1f5   : > { %v2132_v33 = vrot.slane %v2076_v53, 3 }
 0x1f6   : > { %2169 = vst [vmem:[#allocation2 + $0x38] sm:$0xff] %v4260_v57  ;;  %v3341_v9 = vpop.f32.mrf.mxu0  ;;  %v2771_v34 = vpack.c.bf16 %v4260_v57, %v4251_v21  ;;  %v2274_v47 = vmul.f32 %v4260_v57, %v4260_v57 }
 0x1f7   : > { %v2133_v44 = vsel %vm2114_vm4, %v2130_v52, %v2132_v33 }
 0x1f8   : > { %v4271_v26 = vadd.f32 %v2133_v44, %v1922_v2  ;;  %v2079_v55 = vpop.f32.mrf.mxu0  ;;  %2785 = vst [vmem:[%s4118_s29 + $0x18] sm:$0xff] %v2771_v34  }
 0x1f9   : > { %v2134_v10 = vrot.slane %v2079_v55, 3 }
 0x1fa   : > { %2170 = vst [vmem:[#allocation2 + $0x40] sm:$0xff] %v4271_v26  ;;  %v3342_v19 = vpop.f32.mrf.mxu0  ;;  %v2275_v22 = vmul.f32 %v4271_v26, %v4271_v26 }
 0x1fb   : > { %v2135_v17 = vsel %vm2114_vm4, %v2132_v33, %v2134_v10 }
 0x1fc   : > { %v2159_v45 = vadd.f32 %v2135_v17, %v1923_v59  ;;  %v2084_v46 = vpop.f32.mrf.mxu0 }
 0x1fd   : > { %v2136_v62 = vrot.slane %v2084_v46, 3 }
 0x1fe   : > { %2171 = vst [vmem:[#allocation2 + $0x48] sm:$0xff] %v2159_v45  ;;  %v3345_v54 = vpop.f32.mrf.mxu0  ;;  %v2776_v32 = vpack.c.bf16 %v2159_v45, %v4271_v26  ;;  %v2276_v7 = vmul.f32 %v2159_v45, %v2159_v45 }
 0x1ff   : > { %v2137_v58 = vsel %vm2114_vm4, %v2134_v10, %v2136_v62  ;;  %v2161_v63 = vadd.f32 %v2136_v62, %v2101_v1 }
 0x200   : > { %v2160_v60 = vadd.f32 %v2137_v58, %v1924_v51  ;;  %v2087_v61 = vpop.f32.mrf.mxu0  ;;  %2786 = vst [vmem:[%s4118_s29 + $0x20] sm:$0xff] %v2776_v32  }
 0x201   : > { %2173 = vst [vmem:[#allocation2 + $0x58] sm:$0x1] %v2161_v63 }
 0x202   : > { %2172 = vst [vmem:[#allocation2 + $0x50] sm:$0xff] %v2160_v60  ;;  %v3346_v43 = vpop.f32.mrf.mxu0  ;;  %v2277_v6 = vmul.f32 %v2160_v60, %v2160_v60 }
 0x208   : > { %v2185_v15 = vld [vmem:[#allocation2 + $0x58] sm:$0xff] }
 0x209   : > { %3350 = vmatpush3.msra.mxu1 %v2185_v15  ;;  %v2781_v5 = vpack.c.bf16 %v2185_v15, %v2160_v60  ;;  %v2278_v0 = vmul.f32 %v2185_v15, %v2185_v15 }
 0x20a   : > { %3351 = vmatprep.subr.mxu1 %v4031_v40 }
 0x20b   : > { %3352 = vmatpush3.msra.mxu1 %v2160_v60  ;;  %2787 = vst [vmem:[%s4118_s29 + $0x28] sm:$0xff] %v2781_v5  }
 0x20c   : > { %3353 = vmatprep.subr.mxu1 %v4031_v40 }
 0x20d   : > { %3354 = vmatpush3.msra.mxu1 %v2159_v45 }
 0x20e   : > { %3355 = vmatprep.subr.mxu1 %v4031_v40 }
 0x20f   : > { %3356 = vmatpush3.msra.mxu1 %v4271_v26 }
 0x210   : > { %3357 = vmatprep.subr.mxu1 %v4031_v40 }
 0x211   : > { %3358 = vmatpush3.msra.mxu1 %v4260_v57 }
 0x212   : > { %3359 = vmatprep.subr.mxu1 %v4031_v40 }
 0x213   : > { %3360 = vmatpush3.msra.mxu1 %v4251_v21 }
 0x214   : > { %3361 = vmatprep.subr.mxu1 %v4031_v40 }
 0x215   : > { %3362 = vmatpush3.msra.mxu1 %v4240_v3  ;;  %v2268_v3 = vmul.f32 %v4198_v4, %v4198_v4 }
 0x216   : > { %3363 = vmatprep.subr.mxu1 %v4031_v40 }
 0x217   : > { %3364 = vmatpush3.msra.mxu1 %v4230_v38  ;;  %v2267_v38 = vmul.f32 %v4189_v50, %v4189_v50 }
 0x218   : > { %3365 = vmatprep.subr.mxu1 %v4031_v40 }
 0x219   : > { %3366 = vmatpush3.msra.mxu1 %v4219_v41 }
 0x21a   : > { %3367 = vmatprep.subr.mxu1 %v4031_v40 }
 0x21b   : > { %3368 = vmatpush3.msra.mxu1 %v4209_v48 }
 0x21c   : > { %3369 = vmatprep.subr.mxu1 %v4031_v40 }
 0x21d   : > { %3370 = vmatpush3.msra.mxu1 %v4198_v4 }
 0x21e   : > { %3371 = vmatprep.subr.mxu1 %v4031_v40 }
 0x21f   : > { %3372 = vmatpush3.msra.mxu1 %v4189_v50 }
 0x220   : > { %3376 = vmatprep.subr.mxu1 %v4031_v40  ;;  %3374 = vmatmul.mubr.msk.f32.vlgmr.msra.gmra.mxu1 %vm2188_vm5, %v2187_v24 }
 0x221   : > { %3377 = vmatpush3.msk.msra.mxu1 %vm2192_vm2, %v2279_v20  ;;  %3402 = vmatprep.mubr.msk.f32.mxu1 %vm3505_vm0, %v4031_v40 }
 0x222   : > { %3378 = vmatprep.subr.mxu1 %v4031_v40 }
 0x223   : > { %3379 = vmatpush3.msra.mxu1 %v2278_v0 }
 0x224   : > { %3380 = vmatprep.subr.mxu1 %v4031_v40 }
 0x225   : > { %3381 = vmatpush3.msra.mxu1 %v2277_v6 }
 0x226   : > { %3382 = vmatprep.subr.mxu1 %v4031_v40 }
 0x227   : > { %3383 = vmatpush3.msra.mxu1 %v2276_v7 }
 0x228   : > { %3384 = vmatprep.subr.mxu1 %v4031_v40 }
 0x229   : > { %3385 = vmatpush3.msra.mxu1 %v2275_v22 }
 0x22a   : > { %3386 = vmatprep.subr.mxu1 %v4031_v40 }
 0x22b   : > { %3387 = vmatpush3.msra.mxu1 %v2274_v47 }
 0x22c   : > { %3388 = vmatprep.subr.mxu1 %v4031_v40 }
 0x22d   : > { %3389 = vmatpush3.msra.mxu1 %v2273_v8 }
 0x22e   : > { %3390 = vmatprep.subr.mxu1 %v4031_v40 }
 0x22f   : > { %3391 = vmatpush3.msra.mxu1 %v2272_v25 }
 0x230   : > { %3392 = vmatprep.subr.mxu1 %v4031_v40 }
 0x231   : > { %3393 = vmatpush3.msra.mxu1 %v2271_v11 }
 0x232   : > { %3394 = vmatprep.subr.mxu1 %v4031_v40 }
 0x233   : > { %3395 = vmatpush3.msra.mxu1 %v2270_v30 }
 0x234   : > { %3396 = vmatprep.subr.mxu1 %v4031_v40 }
 0x235   : > { %3397 = vmatpush3.msra.mxu1 %v2269_v39 }
 0x236   : > { %3398 = vmatprep.subr.mxu1 %v4031_v40 }
 0x237   : > { %3399 = vmatpush3.msra.mxu1 %v2268_v3 }
 0x238   : > { %3400 = vmatprep.subr.mxu1 %v4031_v40 }
 0x239   : > { %3401 = vmatpush3.msra.mxu1 %v2267_v38 }
 0x23a   : > { %3403 = vmatmul.mubr.msk.f32.vlgmr.msra.gmra.mxu1 %vm2188_vm5, %v2187_v24 }
 0x2e0   : > { %v2262_v48 = vpop.f32.mrf.mxu1 }
 0x2e1   : > { %2266 = vst [vmem:[%s208_s9] sm:$0x1] %v2262_v48 }
 0x2e2   : > { %v3375_v4 = vpop.f32.mrf.mxu1 }
 0x2fa   : > { %v2349_v41 = vpop.f32.mrf.mxu1 }
 0x2fb   : > { %2353 = vst [vmem:[%s208_s9 + $0x1] sm:$0x1] %v2349_v41 }
 0x2fc   : > { %v3404_v12 = vpop.f32.mrf.mxu1 }
 0x2fd PF: > { %s15_s15 = sadd.s32 1, %s3502_s15  }
 0x2fe   : > { %p12_p4 = scmp.ge.s32.totalorder %s15_s15, 4  }
 0x300   :  { %14 = sbr.rel (!%p12_p4) target bundleno = 1 (0x1), region = 82 }

</bundles_post_ra>
